<compile_context>
chip_gen: v5e
topology: v5e:2x2
jax: 0.10.0
libtpu: 0.0.40
codegen_flags: <defaults>
</compile_context>

<pallas_src>
import functools
import math

import jax
import jax.numpy as jnp
from jax.experimental import pallas as pl
from jax.experimental.pallas import tpu as pltpu
from jax.scipy.special import erf as _erf_exact

_INV_SQRT_2PI = 1.0 / math.sqrt(2.0 * math.pi)
_INV_SQRT_2 = 1.0 / math.sqrt(2.0)

_ERF_A = (0.254829592, -0.284496736, 1.421413741, -1.453152027, 1.061405429)
_ERF_P = 0.3275911


# ----------------------------------------------------------------------------
# elementwise helpers
# ----------------------------------------------------------------------------
def _erf_in_kernel(z):
    # Abramowitz & Stegun 7.1.26 with an EUP approximate reciprocal for 1/(1+p|z|).
    # Accuracy ~1e-3 (the approx reciprocal dominates the polynomial's error) —
    # plenty for the mixture; use approx=False if tighter accuracy is needed.
    a1, a2, a3, a4, a5 = _ERF_A
    az = jnp.abs(z)
    t = pl.reciprocal(1.0 + _ERF_P * az, approx=True)
    sgn = jnp.where(z >= 0.0, 1.0, -1.0)
    poly = ((((a5 * t + a4) * t + a3) * t + a2) * t + a1) * t
    return sgn * (1.0 - poly * jnp.exp(-(z * z)))


def _ex_relu(mu, sigma):
    # E[relu(X)] for X ~ N(mu, sigma) (sigma is the variance), as in the repo.
    is_zero = sigma == 0.0
    sigma_s = jnp.where(is_zero, 1.0, sigma)
    inv_sqrt = jax.lax.rsqrt(sigma_s)            # EUP rsqrt instead of sqrt + divide
    sqrt_sigma = sigma_s * inv_sqrt
    w = mu * inv_sqrt
    nr = sqrt_sigma * (jnp.exp(-0.5 * w * w) * _INV_SQRT_2PI
                       + 0.5 * w * (1.0 + _erf_in_kernel(w * _INV_SQRT_2)))
    return jnp.where(is_zero, jnp.maximum(mu, 0.0), nr)


# ----------------------------------------------------------------------------
# stage 0: fused responsibilities + per-component feature transform (one dot)
# ----------------------------------------------------------------------------
def _feature_kernel(twidth, x_ref, wcomb_ref, logc_ref, t_ref, gamma_ref):
    x = x_ref[...]                                   # (TM, F) f32, NaN = missing
    isnan = x != x
    nan_f = jnp.where(isnan, 1.0, 0.0)
    xf = jnp.where(isnan, 0.0, x)

    # single lane concat + single MXU push:
    #   columns [0:twidth)          -> T = [tx_0..tx_{K-1} | tc_0..tc_{K-1}]
    #   columns [twidth:twidth+K)   -> responsibility logits (up to the bias row)
    qin = jnp.concatenate([xf * xf, xf, nan_f], axis=1)                       # (TM, 3F)
    comb = jnp.dot(qin, wcomb_ref[...], preferred_element_type=jnp.float32)   # (TM, 2KH+K)

    t_ref[...] = comb[:, :twidth].astype(t_ref.dtype)

    logits = comb[:, twidth:] + logc_ref[...]
    m = jnp.max(logits, axis=1, keepdims=True)
    e = jnp.exp(logits - m)
    gamma_ref[...] = (e / jnp.sum(e, axis=1, keepdims=True)).astype(gamma_ref.dtype)


# ----------------------------------------------------------------------------
# stage 1: tiled adj @ T, wide expected-ReLU mixture, fold W2 -> z = x1 @ W2
# ----------------------------------------------------------------------------
def _layer1_conv_kernel(kh, tn, resident_t,
                        adj_ref, t_ref, gamma_ref, b1kh_ref, gexp_ref, w2k_ref,
                        z_ref, acc_ref):
    j = pl.program_id(1)

    @pl.when(j == 0)
    def _():
        acc_ref[...] = jnp.zeros_like(acc_ref)

    if resident_t:
        # whole T lives in VMEM; take the neighbor-row slab for this step
        start = pl.multiple_of(j * tn, 128)
        t_blk = t_ref[pl.ds(start, tn), :]
    else:
        t_blk = t_ref[...]

    acc_ref[...] += jnp.dot(adj_ref[...], t_blk,
                            preferred_element_type=jnp.float32)

    @pl.when(j == pl.num_programs(1) - 1)
    def _():
        acc = acc_ref[...]                           # (TM, 2*K*H) f32
        cx = acc[:, :kh] + b1kh_ref[...]             # (TM, K*H)
        cc = jnp.maximum(acc[:, kh:], 0.0)           # clamp low-precision drift
        e = _ex_relu(cx, cc)                         # ONE wide EUP/VALU pass
        # gamma mixture + W2 fold on the (otherwise idle) MXU:
        #   x1 = sum_k gamma_k * e_k ; z = x1 @ W2 = (gamma_wide * e) @ vstack_K(W2)
        gwide = jnp.dot(gamma_ref[...], gexp_ref[...],
                        preferred_element_type=jnp.float32)    # (TM, K*H)
        z = jnp.dot(gwide * e, w2k_ref[...],
                    preferred_element_type=jnp.float32)        # (TM, C)
        z_ref[...] = z.astype(z_ref.dtype)


# ----------------------------------------------------------------------------
# stage 2: tiled adj @ z + b2, log_softmax
# ----------------------------------------------------------------------------
def _layer2_kernel(adj_ref, z_ref, b2_ref, out_ref, acc_ref):
    j = pl.program_id(1)

    @pl.when(j == 0)
    def _():
        acc_ref[...] = jnp.zeros_like(acc_ref)

    acc_ref[...] += jnp.dot(adj_ref[...], z_ref[...],
                            preferred_element_type=jnp.float32)

    @pl.when(j == pl.num_programs(1) - 1)
    def _():
        logits = acc_ref[...] + b2_ref[...]
        m = jnp.max(logits, axis=1, keepdims=True)
        lse = jnp.log(jnp.sum(jnp.exp(logits - m), axis=1, keepdims=True)) + m
        out_ref[...] = (logits - lse).astype(out_ref.dtype)


# ----------------------------------------------------------------------------
# wrapper helpers
# ----------------------------------------------------------------------------
def _round_up(n, m):
    return ((n + m - 1) // m) * m


def _choose_tile(n_pad, target, align, min_tiles=1):
    """Largest multiple of `align` that divides n_pad, is <= target and leaves at
    least `min_tiles` tiles; falls back to `align` (which always divides n_pad)."""
    best = None
    t = align
    lim = min(target, n_pad)
    while t <= lim:
        if n_pad % t == 0 and (n_pad // t) >= min_tiles:
            best = t
        t += align
    return best if best is not None else min(align, n_pad)


def _default_vmem_limit_bytes():
    cap = None
    try:
        cap = getattr(pltpu.get_tpu_info(), "vmem_capacity_bytes", None)
    except Exception:
        cap = None
    if not cap:
        cap = 64 * 1024 * 1024          # conservative: assume v7x per-TC VMEM
    return int(min(cap * 0.70, 100 * 1024 * 1024))


def _make_adj_spec(tm, tn, buffers):
    idx = lambda i, j: (i, j)
    if buffers and buffers > 2:
        try:
            return pl.BlockSpec((tm, tn), idx, pipeline_mode=pl.Buffered(buffers))
        except Exception:               # pipeline_mode unsupported -> default buffering
            pass
    return pl.BlockSpec((tm, tn), idx)


# ----------------------------------------------------------------------------
# forward
# ----------------------------------------------------------------------------
def gcnmf_forward(x, adj, params, *, node_tile=None, nbr_tile=None,
                  compute_dtype=jnp.bfloat16, vmem_limit_bytes=None,
                  adj_buffers=3, t_resident=None):
    n, nfeat = x.shape
    means = params["means"].astype(jnp.float32)
    logvars = params["logvars"].astype(jnp.float32)
    logp = params["logp"].astype(jnp.float32)
    w1 = params["w1"].astype(jnp.float32)
    b1 = params["b1"].astype(jnp.float32).reshape(1, -1)
    w2 = params["w2"].astype(jnp.float32)
    b2 = params["b2"].astype(jnp.float32).reshape(1, -1)

    k_comp = means.shape[0]
    nhid = w1.shape[1]
    nclass = w2.shape[1]
    kh = k_comp * nhid
    tw = 2 * kh                                       # fused adj-matmul width

    # ---- tiling + padding (pad N instead of falling back to full-dim blocks) ----
    if node_tile is None and nbr_tile is None:
        n_pad = _round_up(n, 128)
        tm = _choose_tile(n_pad, 512, 128, min_tiles=2)   # >=2 row tiles -> v7x 2 TCs
        tn = _choose_tile(n_pad, 512, 128, min_tiles=1)
    else:
        tm = node_tile if node_tile is not None else 256
        tn = nbr_tile if nbr_tile is not None else 256
        assert tm % 8 == 0 and tn % 128 == 0, (tm, tn)
        n_pad = _round_up(n, math.lcm(tm, tn))
    pad = n_pad - n

    itemsize = jnp.dtype(compute_dtype).itemsize
    if vmem_limit_bytes is None:
        vmem_limit_bytes = _default_vmem_limit_bytes()

    # VMEM-resident T (stage 1): whole T DMA'd once instead of once per row tile.
    fixed_bytes = (max(adj_buffers, 2) * tm * tn * itemsize
                   + tm * tw * 4 + 4 * 1024 * 1024)
    if t_resident is None:
        t_resident = 2 * n_pad * tw * itemsize <= max(vmem_limit_bytes - fixed_bytes, 0)

    # ---- parameter-only preprocessing (tiny, plain JAX, done once) ----
    variances = jnp.exp(logvars)                                   # (K, F)
    qa = (0.5 / variances).T                                       # (F, K)
    qb = (means / variances).T                                     # (F, K)
    qc = (0.5 * means * means / variances).T                       # (F, K)
    logc = (logp - 0.5 * nfeat * math.log(2.0 * math.pi)
            - 0.5 * jnp.sum(logvars, axis=1)).reshape(1, k_comp)   # (1, K)
    logc_adj = logc - jnp.sum(qc, axis=0, keepdims=True)           # fold mask=1-nan_f

    w1sq = w1 * w1
    wmu = jnp.transpose(means[:, :, None] * w1[None, :, :],
                        (1, 0, 2)).reshape(nfeat, kh)              # (F, K*H)
    wvar = jnp.transpose(variances[:, :, None] * w1sq[None, :, :],
                         (1, 0, 2)).reshape(nfeat, kh)             # (F, K*H)
    zf = jnp.zeros((nfeat, kh), jnp.float32)
    # combined stage-0 weight, columns = [tx_0..tx_{K-1} | tc_0..tc_{K-1} | logits]
    row_x2 = jnp.concatenate([zf, zf, -qa], axis=1)                # multiplies x^2
    row_x = jnp.concatenate([jnp.tile(w1, (1, k_comp)), zf, qb], axis=1)   # x
    row_nan = jnp.concatenate([wmu, wvar, qc], axis=1)             # isnan indicator
    wcomb = jnp.concatenate([row_x2, row_x, row_nan], axis=0)      # (3F, 2KH + K)

    b1kh = jnp.tile(b1, (1, k_comp))                               # (1, K*H)
    gexp = jnp.kron(jnp.eye(k_comp, dtype=jnp.float32),
                    jnp.ones((1, nhid), jnp.float32))              # (K, K*H)
    w2k = jnp.tile(w2, (k_comp, 1))                                # (K*H, C)

    # padded inputs: padded rows are zeros (finite, dropped at the end)
    x_p = jnp.pad(x.astype(jnp.float32), ((0, pad), (0, 0)))
    adj_p = jnp.pad(adj.astype(jnp.float32), ((0, pad), (0, pad))).astype(compute_dtype)

    cp1 = pltpu.CompilerParams(dimension_semantics=("parallel",),
                               vmem_limit_bytes=vmem_limit_bytes)
    cp2 = pltpu.CompilerParams(dimension_semantics=("parallel", "arbitrary"),
                               vmem_limit_bytes=vmem_limit_bytes)

    # ---- stage 0 ----
    t_mat, gamma = pl.pallas_call(
        functools.partial(_feature_kernel, tw),
        out_shape=(jax.ShapeDtypeStruct((n_pad, tw), compute_dtype),
                   jax.ShapeDtypeStruct((n_pad, k_comp), jnp.float32)),
        grid=(n_pad // tm,),
        in_specs=[
            pl.BlockSpec((tm, nfeat), lambda i: (i, 0)),
            pl.BlockSpec((3 * nfeat, tw + k_comp), lambda i: (0, 0)),
            pl.BlockSpec((1, k_comp), lambda i: (0, 0)),
        ],
        out_specs=(pl.BlockSpec((tm, tw), lambda i: (i, 0)),
                   pl.BlockSpec((tm, k_comp), lambda i: (i, 0))),
        compiler_params=cp1,
    )(x_p, wcomb, logc_adj)

    # ---- stage 1 ----
    if t_resident:
        t_spec = pl.BlockSpec((n_pad, tw), lambda i, j: (0, 0))    # DMA'd once
    else:
        t_spec = pl.BlockSpec((tn, tw), lambda i, j: (j, 0))       # streamed per j

    z = pl.pallas_call(
        functools.partial(_layer1_conv_kernel, kh, tn, bool(t_resident)),
        out_shape=jax.ShapeDtypeStruct((n_pad, nclass), compute_dtype),
        grid=(n_pad // tm, n_pad // tn),
        in_specs=[
            _make_adj_spec(tm, tn, adj_buffers),                   # adj tile
            t_spec,                                                # T
            pl.BlockSpec((tm, k_comp), lambda i, j: (i, 0)),       # gamma (own rows)
            pl.BlockSpec((1, kh), lambda i, j: (0, 0)),            # b1 tiled K times
            pl.BlockSpec((k_comp, kh), lambda i, j: (0, 0)),       # gamma expand
            pl.BlockSpec((kh, nclass), lambda i, j: (0, 0)),       # vstack_K(W2)
        ],
        out_specs=pl.BlockSpec((tm, nclass), lambda i, j: (i, 0)),
        scratch_shapes=[pltpu.VMEM((tm, tw), jnp.float32)],
        compiler_params=cp2,
    )(adj_p, t_mat, gamma, b1kh, gexp, w2k)

    # ---- stage 2 ----
    out = pl.pallas_call(
        _layer2_kernel,
        out_shape=jax.ShapeDtypeStruct((n_pad, nclass), jnp.float32),
        grid=(n_pad // tm, n_pad // tn),
        in_specs=[
            _make_adj_spec(tm, tn, adj_buffers),                   # adj tile
            pl.BlockSpec((tn, nclass), lambda i, j: (j, 0)),       # z (neighbor rows)
            pl.BlockSpec((1, nclass), lambda i, j: (0, 0)),        # b2
        ],
        out_specs=pl.BlockSpec((tm, nclass), lambda i, j: (i, 0)),
        scratch_shapes=[pltpu.VMEM((tm, nclass), jnp.float32)],
        compiler_params=cp2,
    )(adj_p, z, b2)

    return out[:n]


# ----------------------------------------------------------------------------
# pure-JAX reference (mirrors the PyTorch module's forward, f32)
# ----------------------------------------------------------------------------
def _ex_relu_ref(mu, sigma):
    is_zero = sigma == 0.0
    sigma_s = jnp.where(is_zero, 1.0, sigma)
    sq = jnp.sqrt(sigma_s)
    w = mu / sq
    nr = sq * (jnp.exp(-0.5 * w * w) * _INV_SQRT_2PI
               + 0.5 * w * (1.0 + _erf_exact(w * _INV_SQRT_2)))
    return jnp.where(is_zero, jnp.maximum(mu, 0.0), nr)


def gcnmf_reference(x, adj, params):
    means, logvars, logp = params["means"], params["logvars"], params["logp"]
    w1, b1, w2, b2 = params["w1"], params["b1"], params["w2"], params["b2"]
    k_comp, nfeat = means.shape
    variances = jnp.exp(logvars)
    isnan = jnp.isnan(x)
    e_list, logit_cols = [], []
    for k in range(k_comp):
        mean_mat = jnp.where(isnan, means[k], x)
        var_mat = jnp.where(isnan, variances[k], 0.0)
        tx = mean_mat @ w1
        tc = var_mat @ (w1 * w1)
        cx = adj @ tx + b1
        cc = adj @ tc
        e_list.append(_ex_relu_ref(cx, cc))
        quad = jnp.sum((mean_mat - means[k]) ** 2 / (2.0 * variances[k]),
                       axis=1, keepdims=True)
        log_n = (-0.5 * nfeat * math.log(2.0 * math.pi)
                 - 0.5 * jnp.sum(logvars[k]) - quad)
        logit_cols.append(logp[k] + log_n)
    logits = jnp.concatenate(logit_cols, axis=1)
    gamma = jax.nn.softmax(logits, axis=1)
    x1 = sum(e_list[k] * gamma[:, k:k + 1] for k in range(k_comp))
    out = adj @ (x1 @ w2) + b2
    return jax.nn.log_softmax(out, axis=1)


# ----------------------------------------------------------------------------
if __name__ == "__main__":
    # Small synthetic graph: N nodes (deliberately NOT a multiple of 128 to
    # exercise padding), F features (with NaNs), H=nhid, C classes, K=5 components.
    N, F_, H, C, K = 250, 32, 16, 8, 5

    key = jax.random.PRNGKey(0)
    (k_x, k_mask, k_adj, k_means, k_lv,
     k_w1, k_b1, k_w2, k_b2) = jax.random.split(key, 9)

    x = jax.random.normal(k_x, (N, F_), dtype=jnp.float32)
    miss = jax.random.bernoulli(k_mask, 0.2, (N, F_))
    x = jnp.where(miss, jnp.nan, x)                      # missing entries = NaN

    # Dense symmetric normalized adjacency: D^-1/2 (A + I) D^-1/2
    a = (jax.random.uniform(k_adj, (N, N)) < 0.05).astype(jnp.float32)
    a = jnp.maximum(a, a.T) + jnp.eye(N, dtype=jnp.float32)
    dinv = jax.lax.rsqrt(jnp.sum(a, axis=1))
    adj = a * dinv[:, None] * dinv[None, :]

    # Deterministic synthetic GMM parameters (repo fits sklearn GMM in __init__).
    logp = jnp.full((K,), math.log(1.0 / K), dtype=jnp.float32)
    means = 0.5 * jax.random.normal(k_means, (K, F_), dtype=jnp.float32)
    logvars = 0.2 * jax.random.normal(k_lv, (K, F_), dtype=jnp.float32)

    stdv1 = 1.0 / math.sqrt(H)
    w1 = jax.random.uniform(k_w1, (F_, H), minval=-stdv1, maxval=stdv1,
                            dtype=jnp.float32)
    b1 = jax.random.uniform(k_b1, (H,), minval=-stdv1, maxval=stdv1,
                            dtype=jnp.float32)
    stdv2 = 1.0 / math.sqrt(C)
    w2 = jax.random.uniform(k_w2, (H, C), minval=-stdv2, maxval=stdv2,
                            dtype=jnp.float32)
    b2 = jax.random.uniform(k_b2, (C,), minval=-stdv2, maxval=stdv2,
                            dtype=jnp.float32)

    params = dict(logp=logp, means=means, logvars=logvars,
                  w1=w1, b1=b1, w2=w2, b2=b2)

    ref = gcnmf_reference(x, adj, params)

    # f32 path, auto tiles + padding + resident-T (tight check)
    out32 = gcnmf_forward(x, adj, params, compute_dtype=jnp.float32)
    out32 = jax.block_until_ready(out32)
    assert out32.shape == (N, C), out32.shape
    assert bool(jnp.all(jnp.isfinite(out32))), "non-finite output (f32 path)"
    assert bool(jnp.allclose(jnp.sum(jnp.exp(out32), axis=1), 1.0, atol=1e-4))
    err32 = float(jnp.max(jnp.abs(out32 - ref)))
    assert err32 < 5e-2, f"f32 kernel vs reference mismatch: {err32}"

    # bf16-adj path (default) — loose check
    outbf = gcnmf_forward(x, adj, params)
    outbf = jax.block_until_ready(outbf)
    assert outbf.shape == (N, C), outbf.shape
    assert bool(jnp.all(jnp.isfinite(outbf))), "non-finite output (bf16 path)"
    assert bool(jnp.allclose(jnp.sum(jnp.exp(outbf), axis=1), 1.0, atol=1e-4))
    errbf = float(jnp.max(jnp.abs(outbf - ref)))
    assert errbf < 0.5, f"bf16 kernel vs reference mismatch: {errbf}"

    # streamed-T branch (non-resident), bf16 — exercises the other stage-1 path
    outst = gcnmf_forward(x, adj, params, t_resident=False)
    outst = jax.block_until_ready(outst)
    errst = float(jnp.max(jnp.abs(outst - ref)))
    assert errst < 0.5, f"streamed-T kernel vs reference mismatch: {errst}"

    print("KERNEL_OK")
</pallas_src>

<mosaic_0001>
module attributes {stable_mosaic.version = 11 : i64} {
  func.func @_feature_kernel(%arg0: i32, %arg1: memref<128x32xf32, #tpu.memory_space<vmem>>, %arg2: memref<96x165xf32, #tpu.memory_space<vmem>>, %arg3: memref<1x5xf32, #tpu.memory_space<vmem>>, %arg4: memref<128x160xf32, #tpu.memory_space<vmem>>, %arg5: memref<128x5xf32, #tpu.memory_space<vmem>>) attributes {dimension_semantics = [#tpu.dimension_semantics<parallel>], iteration_bounds = array<i64: 2>, scalar_prefetch = 0 : i64, scratch_operands = 0 : i64, tpu.core_type = #tpu.core_type<tc>, window_params = [{transform_indices = @transform_0, window_bounds = array<i64: 128, 32>}, {pipeline_mode = #tpu.pipeline_mode<synchronous>, transform_indices = @transform_1, window_bounds = array<i64: 96, 165>}, {pipeline_mode = #tpu.pipeline_mode<synchronous>, transform_indices = @transform_2, window_bounds = array<i64: 1, 5>}, {transform_indices = @transform_3, window_bounds = array<i64: 128, 160>}, {transform_indices = @transform_4, window_bounds = array<i64: 128, 5>}]} {
    %c0 = arith.constant 0 : index
    %c0_0 = arith.constant 0 : index
    %0 = vector.load %arg1[%c0, %c0_0] : memref<128x32xf32, #tpu.memory_space<vmem>>, vector<128x32xf32>
    %1 = arith.cmpf one, %0, %0 : vector<128x32xf32>
    %cst = arith.constant 1.000000e+00 : f32
    %cst_1 = arith.constant 0.000000e+00 : f32
    %2 = vector.broadcast %cst : f32 to vector<128x32xf32>
    %3 = vector.broadcast %cst_1 : f32 to vector<128x32xf32>
    %4 = arith.select %1, %2, %3 : vector<128x32xi1>, vector<128x32xf32>
    %cst_2 = arith.constant 0.000000e+00 : f32
    %5 = vector.broadcast %cst_2 : f32 to vector<128x32xf32>
    %6 = arith.select %1, %5, %0 : vector<128x32xi1>, vector<128x32xf32>
    %7 = arith.mulf %6, %6 : vector<128x32xf32>
    %8 = tpu.concatenate %7, %6, %4 in 1 : vector<128x32xf32>, vector<128x32xf32>, vector<128x32xf32> -> vector<128x96xf32>
    %c0_3 = arith.constant 0 : index
    %c0_4 = arith.constant 0 : index
    %9 = vector.load %arg2[%c0_3, %c0_4] : memref<96x165xf32, #tpu.memory_space<vmem>>, vector<96x165xf32>
    %cst_5 = arith.constant dense<0.000000e+00> : vector<128x165xf32>
    %10 = tpu.matmul %8, %9, %cst_5 {dimension_numbers = #tpu.dot_dimension_numbers<[1], [0], [0], [1], [0, 0, 1, 1], [], []>} : vector<128x96xf32>, vector<96x165xf32>, vector<128x165xf32> -> vector<128x165xf32>
    %11 = vector.extract_strided_slice %10 {offsets = [0, 0], sizes = [128, 160], strides = [1, 1]} : vector<128x165xf32> to vector<128x160xf32>
    %c0_6 = arith.constant 0 : index
    %c0_7 = arith.constant 0 : index
    %12 = vector.load %arg4[%c0_6, %c0_7] : memref<128x160xf32, #tpu.memory_space<vmem>>, vector<128x160xf32>
    tpu.vector_store %arg4[%c0_6, %c0_7], %11 {strides = array<i32>} : memref<128x160xf32, #tpu.memory_space<vmem>>, vector<128x160xf32>,
    %13 = vector.extract_strided_slice %10 {offsets = [0, 160], sizes = [128, 5], strides = [1, 1]} : vector<128x165xf32> to vector<128x5xf32>
    %c0_8 = arith.constant 0 : index
    %c0_9 = arith.constant 0 : index
    %14 = vector.load %arg3[%c0_8, %c0_9] : memref<1x5xf32, #tpu.memory_space<vmem>>, vector<1x5xf32>
    %15 = vector.broadcast %14 : vector<1x5xf32> to vector<128x5xf32>
    %16 = arith.addf %13, %15 : vector<128x5xf32>
    %cst_10 = arith.constant dense<0xFF800000> : vector<128xf32>
    %17 = vector.multi_reduction <maximumf>, %16, %cst_10 [1] : vector<128x5xf32> to vector<128xf32>
    %18 = vector.shape_cast %17 : vector<128xf32> to vector<128x1xf32>
    %19 = vector.broadcast %18 : vector<128x1xf32> to vector<128x5xf32>
    %20 = arith.subf %16, %19 : vector<128x5xf32>
    %21 = math.exp %20 : vector<128x5xf32>
    %cst_11 = arith.constant dense<0.000000e+00> : vector<128xf32>
    %22 = vector.multi_reduction <add>, %21, %cst_11 [1] : vector<128x5xf32> to vector<128xf32>
    %23 = vector.shape_cast %22 : vector<128xf32> to vector<128x1xf32>
    %24 = vector.broadcast %23 : vector<128x1xf32> to vector<128x5xf32>
    %25 = arith.divf %21, %24 : vector<128x5xf32>
    %c0_12 = arith.constant 0 : index
    %c0_13 = arith.constant 0 : index
    %26 = vector.load %arg5[%c0_12, %c0_13] : memref<128x5xf32, #tpu.memory_space<vmem>>, vector<128x5xf32>
    tpu.vector_store %arg5[%c0_12, %c0_13], %25 {strides = array<i32>} : memref<128x5xf32, #tpu.memory_space<vmem>>, vector<128x5xf32>,
    return
  }
  func.func @transform_0(%arg0: i32) -> (i32, i32) {
    %c0_i32 = arith.constant 0 : i32
    %c0_i32_0 = arith.constant 0 : i32
    return %arg0, %c0_i32 : i32, i32
  }
  func.func @transform_1(%arg0: i32) -> (i32, i32) {
    %c0_i32 = arith.constant 0 : i32
    %c0_i32_0 = arith.constant 0 : i32
    %c0_i32_1 = arith.constant 0 : i32
    return %c0_i32, %c0_i32_0 : i32, i32
  }
  func.func @transform_2(%arg0: i32) -> (i32, i32) {
    %c0_i32 = arith.constant 0 : i32
    %c0_i32_0 = arith.constant 0 : i32
    %c0_i32_1 = arith.constant 0 : i32
    return %c0_i32, %c0_i32_0 : i32, i32
  }
  func.func @transform_3(%arg0: i32) -> (i32, i32) {
    %c0_i32 = arith.constant 0 : i32
    %c0_i32_0 = arith.constant 0 : i32
    return %arg0, %c0_i32 : i32, i32
  }
  func.func @transform_4(%arg0: i32) -> (i32, i32) {
    %c0_i32 = arith.constant 0 : i32
    %c0_i32_0 = arith.constant 0 : i32
    return %arg0, %c0_i32 : i32, i32
  }
}

</mosaic_0001>

<bundles_post_ra>
// kernel: tpu_custom_call.1
= control target key start
LH: loop header
LB: loop body
LE: loop exit
PB: predicated region body
PF: predicated region fallthrough
CT: control target
= control target key end

     0   :  { %s1558_s15 = smov 0   ;;  %s2414_s0 = inlined_call_operand.vmem [shape: f32[256,32], index: 0, kind: input, shape index: {}]   ;;  %s2415_s1 = inlined_call_operand.vmem [shape: f32[96,165], index: 1, kind: input, shape index: {}]   ;;  %s2416_s2 = inlined_call_operand.vmem [shape: f32[1,5], index: 2, kind: input, shape index: {}]   ;;  %s2417_s3 = inlined_call_operand.vmem [shape: f32[256,160], index: 3, kind: output, shape index: {0}]   ;;  %s2418_s4 = inlined_call_operand.vmem [shape: f32[256,5], index: 4, kind: output, shape index: {1}]  }
   0x1 LB: > { %s1338_s16 = sadd.s32 4294967295, %s1527_s15   ;;  %p1342_p0 = scmp.ge.s32.totalorder %s1527_s15, 1  ;;  %s1527_s15 = sphi %s1558_s15, %s15_s15  }
   0x2   : > { %p166_p1 = scmp.lt.s32.totalorder %s1527_s15, 3 }
   0x4   : > { %p167_p2 = pnand %p1342_p0, %p166_p1 }
   0x5   : > { %s1343_s17 = sshll.u32 (!%p167_p2), %s1338_s16, 4  ;;  %s1529_s22 = smov (!%p167_p2), 32  }
   0x6   : > { %170 = sbr.rel (%p167_p2) target bundleno = 829 (0x33d), region = 32  ;;  %p199_p3 = scmp.lt.s32.totalorder (!%p167_p2), %s1343_s17, 31 }
   0x7   : > { %s1531_s23 = smov (!%p167_p2), 64   ;;  %s1532_s8 = smov (!%p167_p2), 96  }
   0xb   : > { %s2438_s17 = smov (!%p199_p3, %s1343_s17), 31  ;;  %v1530_v6 = vmov 0.0   ;;  %v481_v37 = vld [vmem:[%s2415_s1 + $0xb0] sm:$0xff]  ;;  %v482_v38 = vld [vmem:[%s2415_s1 + $0xb8] sm:$0xff]  ;;  %v479_v41 = vld [vmem:[%s2415_s1 + $0xa0] sm:$0xff] }
   0xc   : > { %s1344_s18 = sshll.u32 %s2438_s17, 3  ;;  %536 = vmatpush.msra.mxu0 %v481_v37  ;;  %1385 = vmatpush.msra.mxu2 %v481_v37  ;;  %v480_v42 = vld [vmem:[%s2415_s1 + $0xa8] sm:$0xff]  ;;  %v477_v43 = vld [vmem:[%s2415_s1 + $0x90] sm:$0xff]  ;;  %v478_v45 = vld [vmem:[%s2415_s1 + $0x98] sm:$0xff] }
   0xd   : > { %s1574_s21 = scalar_lea.vmem %s2414_s0, %s1344_s18  ;;  %601 = vmatpush.msra.mxu1 %v482_v38  ;;  %1397 = vmatpush.msra.mxu3 %v482_v38  ;;  %v475_v48 = vld [vmem:[%s2415_s1 + $0x80] sm:$0xff]  ;;  %v476_v51 = vld [vmem:[%s2415_s1 + $0x88] sm:$0xff]  ;;  %v473_v52 = vld [vmem:[%s2415_s1 + $0x70] sm:$0xff]  ;;  %s2377_s10 = scalar_lea.vmem %s2418_s4, %s1344_s18 }
   0xe   : > { %v225_v0 = vld [vmem:[%s1574_s21 + $0x40] sm:$0xff]  ;;  %v226_v4 = vld [vmem:[%s1574_s21 + $0x48] sm:$0xff]  ;;  %v219_v9 = vld [vmem:[%s1574_s21 + $0x10] sm:$0xff]  ;;  %537 = vmatpush.msra.mxu0 %v479_v41  ;;  %1386 = vmatpush.msra.mxu2 %v479_v41 }
   0xf   : > { %v217_v1 = vld [vmem:[%s1574_s21] sm:$0xff]  ;;  %vm241_vm0 = vcmp.ne.f32.partialorder %v225_v0, %v225_v0  ;;  %v218_v5 = vld [vmem:[%s1574_s21 + $0x8] sm:$0xff]  ;;  %vm242_vm2 = vcmp.ne.f32.partialorder %v226_v4, %v226_v4  ;;  %v227_v14 = vld [vmem:[%s1574_s21 + $0x50] sm:$0xff]  ;;  %vm235_vm4 = vcmp.ne.f32.partialorder %v219_v9, %v219_v9  ;;  %602 = vmatpush.msra.mxu1 %v480_v42  ;;  %1398 = vmatpush.msra.mxu3 %v480_v42 }
  0x10   : > { %vm233_vm1 = vcmp.ne.f32.partialorder %v217_v1, %v217_v1  ;;  %v1578_v2 = vsel %vm241_vm0, 0.0, %v225_v0  ;;  %v257_v7 = vsel %vm241_vm0, 1.0, %v1530_v6  ;;  %vm234_vm3 = vcmp.ne.f32.partialorder %v218_v5, %v218_v5  ;;  %v220_v18 = vld [vmem:[%s1574_s21 + $0x18] sm:$0xff]  ;;  %v221_v25 = vld [vmem:[%s1574_s21 + $0x20] sm:$0xff]  ;;  %v222_v32 = vld [vmem:[%s1574_s21 + $0x28] sm:$0xff]  ;;  %538 = vmatpush.msra.mxu0 %v477_v43  ;;  %1387 = vmatpush.msra.mxu2 %v477_v43 }
  0x11   : > { %v1580_v3 = vsel %vm233_vm1, 0.0, %v217_v1  ;;  %329 = vrot.lane.b32.xlu0 %v1578_v2, %s1529_s22  ;;  %v249_v8 = vsel %vm233_vm1, 1.0, %v1530_v6  ;;  %v250_v11 = vsel %vm234_vm3, 1.0, %v1530_v6  ;;  %v258_v12 = vsel %vm242_vm2, 1.0, %v1530_v6  ;;  %v228_v22 = vld [vmem:[%s1574_s21 + $0x58] sm:$0xff]  ;;  %v229_v29 = vld [vmem:[%s1574_s21 + $0x60] sm:$0xff]  ;;  %603 = vmatpush.msra.mxu1 %v478_v45 }
  0x12   : > { %313 = vrot.lane.b32.xlu1 %v1580_v3, %s1529_s22  ;;  %v1421_v10 = vpack.i.bf16 %v249_v8, %v257_v7  ;;  %v1594_v13 = vsel %vm242_vm2, 0.0, %v226_v4  ;;  %v1426_v15 = vpack.i.bf16 %v250_v11, %v258_v12  ;;  %vm243_vm5 = vcmp.ne.f32.partialorder %v227_v14, %v227_v14  ;;  %v230_v36 = vld [vmem:[%s1574_s21 + $0x68] sm:$0xff]  ;;  %v223_v44 = vld [vmem:[%s1574_s21 + $0x30] sm:$0xff]  ;;  %1399 = vmatpush.msra.mxu3 %v478_v45  ;;  %v474_v53 = vld [vmem:[%s2415_s1 + $0x78] sm:$0xff] }
  0x13   : > { %v259_v16 = vsel %vm243_vm5, 1.0, %v1530_v6  ;;  %v251_v17 = vsel %vm235_vm4, 1.0, %v1530_v6  ;;  %v1606_v20 = vsel %vm234_vm3, 0.0, %v218_v5  ;;  %v1608_v21 = vsel %vm243_vm5, 0.0, %v227_v14  ;;  %v231_v50 = vld [vmem:[%s1574_s21 + $0x70] sm:$0xff]  ;;  %539 = vmatpush.msra.mxu0 %v475_v48  ;;  %1388 = vmatpush.msra.mxu2 %v475_v48  ;;  %v471_v56 = vld [vmem:[%s2415_s1 + $0x60] sm:$0xff] }
  0x14   : > { %1427 = vrot.lane.b32.xlu2 %v1426_v15, %s1531_s23  ;;  %v1431_v19 = vpack.i.bf16 %v251_v17, %v259_v16  ;;  %vm236_vm6 = vcmp.ne.f32.partialorder %v220_v18, %v220_v18  ;;  %vm244_vm7 = vcmp.ne.f32.partialorder %v228_v22, %v228_v22  ;;  %v1621_v27 = vsel %vm235_vm4, 0.0, %v219_v9  ;;  %604 = vmatpush.msra.mxu1 %v476_v51  ;;  %v472_v57 = vld [vmem:[%s2415_s1 + $0x68] sm:$0xff]  ;;  %v232_v61 = vld [vmem:[%s1574_s21 + $0x78] sm:$0xff]  ;;  %v469_v7 = vld [vmem:[%s2415_s1 + $0x50] sm:$0xff] }
  0x15   : > { %v260_v23 = vsel %vm244_vm7, 1.0, %v1530_v6  ;;  %v252_v24 = vsel %vm236_vm6, 1.0, %v1530_v6  ;;  %v1623_v28 = vsel %vm244_vm7, 0.0, %v228_v22  ;;  %vm237_vm8 = vcmp.ne.f32.partialorder %v221_v25, %v221_v25  ;;  %1400 = vmatpush.msra.mxu3 %v476_v51  ;;  %540 = vmatpush.msra.mxu0 %v473_v52  ;;  %v224_v1 = vld [vmem:[%s1574_s21 + $0x38] sm:$0xff]  ;;  %v467_v9 = vld [vmem:[%s2415_s1 + $0x40] sm:$0xff]  ;;  %v464_v14 = vld [vmem:[%s2415_s1 + $0x28] sm:$0xff] }
  0x16   : > { %v1436_v26 = vpack.i.bf16 %v252_v24, %v260_v23  ;;  %vm245_vm9 = vcmp.ne.f32.partialorder %v229_v29, %v229_v29  ;;  %v253_v31 = vsel %vm237_vm8, 1.0, %v1530_v6  ;;  %v1636_v34 = vsel %vm236_vm6, 0.0, %v220_v18  ;;  %1389 = vmatpush.msra.mxu2 %v473_v52  ;;  %605 = vmatpush.msra.mxu1 %v474_v53  ;;  %v470_v8 = vld [vmem:[%s2415_s1 + $0x58] sm:$0xff]  ;;  %v463_v12 = vld [vmem:[%s2415_s1 + $0x20] sm:$0xff]  ;;  %v461_v15 = vld [vmem:[%s2415_s1 + $0x10] sm:$0xff] }
  0x17   : > { %v261_v30 = vsel %vm245_vm9, 1.0, %v1530_v6  ;;  %v1638_v35 = vsel %vm245_vm9, 0.0, %v229_v29  ;;  %vm238_vm10 = vcmp.ne.f32.partialorder %v222_v32, %v222_v32  ;;  %vm246_vm11 = vcmp.ne.f32.partialorder %v230_v36, %v230_v36  ;;  %1401 = vmatpush.msra.mxu3 %v474_v53  ;;  %541 = vmatpush.msra.mxu0 %v471_v56  ;;  %v466_v11 = vld [vmem:[%s2415_s1 + $0x38] sm:$0xff]  ;;  %v459_v17 = vld [vmem:[%s2415_s1] sm:$0xff]  ;;  %v460_v18 = vld [vmem:[%s2415_s1 + $0x8] sm:$0xff] }
  0x18   : > { %v1441_v33 = vpack.i.bf16 %v253_v31, %v261_v30  ;;  %v262_v39 = vsel %vm246_vm11, 1.0, %v1530_v6  ;;  %v254_v40 = vsel %vm238_vm10, 1.0, %v1530_v6  ;;  %v1670_v47 = vsel %vm237_vm8, 0.0, %v221_v25  ;;  %1390 = vmatpush.msra.mxu2 %v471_v56  ;;  %606 = vmatpush.msra.mxu1 %v472_v57  ;;  %v462_v16 = vld [vmem:[%s2415_s1 + $0x18] sm:$0xff]  ;;  %v1456_v22 = vld [vmem:[%s2416_s2] ss:$0 sm:$0xff] }
  0x19   : > { %1422 = vrot.lane.b32.xlu0 %v1421_v10, %s1531_s23  ;;  %v1446_v46 = vpack.i.bf16 %v254_v40, %v262_v39  ;;  %v1676_v49 = vsel %vm246_vm11, 0.0, %v230_v36  ;;  %vm239_vm12 = vcmp.ne.f32.partialorder %v223_v44, %v223_v44  ;;  %vm247_vm13 = vcmp.ne.f32.partialorder %v231_v50, %v231_v50  ;;  %1402 = vmatpush.msra.mxu3 %v472_v57  ;;  %v465_v10 = vld [vmem:[%s2415_s1 + $0x30] sm:$0xff] }
  0x1a   : > { %331 = vrot.lane.b32.xlu1 %v1594_v13, %s1529_s22  ;;  %v263_v54 = vsel %vm247_vm13, 1.0, %v1530_v6  ;;  %v255_v55 = vsel %vm239_vm12, 1.0, %v1530_v6  ;;  %v1704_v59 = vsel %vm238_vm10, 0.0, %v222_v32  ;;  %v1707_v60 = vsel %vm247_vm13, 0.0, %v231_v50  ;;  %542 = vmatpush.msra.mxu0 %v469_v7 }
  0x1b   : > { %v1451_v58 = vpack.i.bf16 %v255_v55, %v263_v54  ;;  %vm248_vm14 = vcmp.ne.f32.partialorder %v232_v61, %v232_v61  ;;  %v1716_v62 = vsel %vm239_vm12, 0.0, %v223_v44  ;;  %vm240_vm15 = vcmp.ne.f32.partialorder %v224_v1, %v224_v1  ;;  %1391 = vmatpush.msra.mxu2 %v469_v7  ;;  %607 = vmatpush.msra.mxu1 %v470_v8 }
  0x1c   : > { %315 = vrot.lane.b32.xlu2 %v1606_v20, %s1529_s22  ;;  %v1718_v63 = vsel %vm248_vm14, 0.0, %v232_v61  ;;  %v264_v0 = vsel %vm248_vm14, 1.0, %v1530_v6  ;;  %v1727_v4 = vsel %vm240_vm15, 0.0, %v224_v1  ;;  %v256_v5 = vsel %vm240_vm15, 1.0, %v1530_v6  ;;  %v468_v6 = vld [vmem:[%s2415_s1 + $0x48] sm:$0xff]  ;;  %1403 = vmatpush.msra.mxu3 %v470_v8 }
  0x1d   : > { %543 = vmatpush.msra.mxu0 %v467_v9  ;;  %1392 = vmatpush.msra.mxu2 %v467_v9  ;;  %v289_v29 = vmul.f32 %v1578_v2, %v1578_v2  ;;  %vm425_vm0 = vcmask 261120   ;;  %vm442_vm1 = vcmask 523264   ;;  %vm483_vm2 = vcmask 785408  }
  0x1e   : > { %608 = vmatpush.msra.mxu1 %v468_v6  ;;  %1404 = vmatpush.msra.mxu3 %v468_v6  ;;  %v290_v38 = vmul.f32 %v1594_v13, %v1594_v13  ;;  %v282_v39 = vmul.f32 %v1606_v20, %v1606_v20  ;;  %v291_v48 = vmul.f32 %v1608_v21, %v1608_v21  ;;  %vm716_vm3 = vcmask 302336  }
  0x1f   : > { %544 = vmatpush.msra.mxu0 %v465_v10  ;;  %1393 = vmatpush.msra.mxu2 %v465_v10  ;;  %v283_v50 = vmul.f32 %v1621_v27, %v1621_v27  ;;  %v284_v61 = vmul.f32 %v1636_v34, %v1636_v34  ;;  %v293_v10 = vmul.f32 %v1638_v35, %v1638_v35  ;;  %vm877_vm4 = vcmask 39936  }
  0x20   : > { %609 = vmatpush.msra.mxu1 %v466_v11  ;;  %1405 = vmatpush.msra.mxu3 %v466_v11  ;;  %v285_v11 = vmul.f32 %v1670_v47, %v1670_v47 }
  0x21   : > { %333 = vrot.lane.b32.xlu0 %v1608_v21, %s1529_s22  ;;  %545 = vmatpush.msra.mxu0 %v463_v12 }
  0x22   : > { %1432 = vrot.lane.b32.xlu1 %v1431_v19, %s1531_s23  ;;  %1394 = vmatpush.msra.mxu2 %v463_v12 }
  0x23   : > { %610 = vmatpush.msra.mxu1 %v464_v14  ;;  %1406 = vmatpush.msra.mxu3 %v464_v14 }
  0x24   : > { %317 = vrot.lane.b32.xlu2 %v1621_v27, %s1529_s22  ;;  %546 = vmatpush.msra.mxu0 %v461_v15 }
  0x25   : > { %1395 = vmatpush.msra.mxu2 %v461_v15  ;;  %611 = vmatpush.msra.mxu1 %v462_v16 }
  0x26   : > { %1407 = vmatpush.msra.mxu3 %v462_v16  ;;  %547 = vmatpush.msra.mxu0 %v459_v17 }
  0x27   : > { %1396 = vmatpush.msra.mxu2 %v459_v17  ;;  %612 = vmatpush.msra.mxu1 %v460_v18 }
  0x28   : > { %1408 = vmatpush.msra.mxu3 %v460_v18 }
  0x29   : > { %335 = vrot.lane.b32.xlu0 %v1623_v28, %s1529_s22 }
  0x2a   : > { %1437 = vrot.lane.b32.xlu1 %v1436_v26, %s1531_s23  ;;  %v281_v26 = vmul.f32 %v1580_v3, %v1580_v3 }
  0x2c   : > { %319 = vrot.lane.b32.xlu2 %v1636_v34, %s1529_s22 }
  0x31   : > { %337 = vrot.lane.b32.xlu0 %v1638_v35, %s1529_s22 }
  0x32   : > { %1442 = vrot.lane.b32.xlu1 %v1441_v33, %s1531_s23 }
  0x34   : > { %321 = vrot.lane.b32.xlu2 %v1670_v47, %s1529_s22 }
  0x39   : > { %339 = vrot.lane.b32.xlu0 %v1676_v49, %s1529_s22 }
  0x3a   : > { %1447 = vrot.lane.b32.xlu1 %v1446_v46, %s1531_s23 }
  0x3c   : > { %323 = vrot.lane.b32.xlu2 %v1704_v59, %s1529_s22 }
  0x41   : > { %341 = vrot.lane.b32.xlu0 %v1707_v60, %s1529_s22 }
  0x42   : > { %1452 = vrot.lane.b32.xlu1 %v1451_v58, %s1531_s23  ;;  %v292_v58 = vmul.f32 %v1623_v28, %v1623_v28 }
  0x44   : > { %325 = vrot.lane.b32.xlu2 %v1716_v62, %s1529_s22 }
  0x49   : > { %343 = vrot.lane.b32.xlu0 %v1718_v63, %s1529_s22 }
  0x4a   : > { %407 = vrot.lane.b32.xlu1 %v264_v0, %s1531_s23 }
  0x4c   : > { %327 = vrot.lane.b32.xlu2 %v1727_v4, %s1529_s22 }
  0x51   : > { %391 = vrot.lane.b32.xlu0 %v256_v5, %s1531_s23 }
  0x52   : > { %697 = vrot.lane.b32.xlu1 %v1456_v22, %s1529_s22  ;;  %v294_v22 = vmul.f32 %v1676_v49, %v1676_v49  ;;  %s1384_s22 = sshll.u32 %s2438_s17, 4 }
  0x53   : > { %s1873_s7 = scalar_lea.vmem %s2417_s3, %s1384_s22 }
  0x6e   : > { %v1428_v19 = vpop.permute.xlu2 %1427 }
  0x6f   : > { %v1430_v41 = vunpack.i.h.bf16 %v1428_v19  ;;  %v1429_v42 = vunpack.i.l.bf16 %v1428_v19 }
  0x76   : > { %v316_v23 = vpop.permute.xlu2 %315 }
  0x77   : > { %v427_v13 = vsel %vm425_vm0, %v282_v39, %v316_v23  ;;  %v286_v23 = vmul.f32 %v1704_v59, %v1704_v59  ;;  %v295_v59 = vmul.f32 %v1707_v60, %v1707_v60 }
  0x78   : > { %v444_v45 = vsel %vm442_vm1, %v427_v13, %v1430_v41  ;;  %v288_v41 = vmul.f32 %v1727_v4, %v1727_v4 }
  0x7e   : > { %v318_v37 = vpop.permute.xlu2 %317 }
  0x7f   : > { %v428_v55 = vsel %vm425_vm0, %v283_v50, %v318_v37 }
  0x83   : > { %v330_v24 = vpop.permute.xlu0 %329 }
  0x84   : > { %v314_v25 = vpop.permute.xlu1 %313  ;;  %v434_v3 = vsel %vm425_vm0, %v289_v29, %v330_v24 }
  0x85   : > { %v426_v30 = vsel %vm425_vm0, %v281_v26, %v314_v25 }
  0x86   : > { %v320_v51 = vpop.permute.xlu2 %319 }
  0x87   : > { %v429_v8 = vsel %vm425_vm0, %v284_v61, %v320_v51 }
  0x8b   : > { %v1423_v31 = vpop.permute.xlu0 %1422 }
  0x8c   : > { %v332_v32 = vpop.permute.xlu1 %331  ;;  %v1425_v33 = vunpack.i.h.bf16 %v1423_v31  ;;  %v1424_v36 = vunpack.i.l.bf16 %v1423_v31 }
  0x8d   : > { %v435_v20 = vsel %vm425_vm0, %v290_v38, %v332_v32  ;;  %v287_v32 = vmul.f32 %v1716_v62, %v1716_v62 }
  0x8e   : > { %v443_v2 = vsel %vm442_vm1, %v426_v30, %v1425_v33  ;;  %v451_v40 = vsel %vm442_vm1, %v434_v3, %v1424_v36  ;;  %v452_v46 = vsel %vm442_vm1, %v435_v20, %v1429_v42  ;;  %v322_v5 = vpop.permute.xlu2 %321 }
  0x8f   : > { %1350 = vmatmul.msk.f32.vlgmr.msra.gmra.mxu0 %vm483_vm2, %v443_v2  ;;  %1358 = vmatmul.msk.f32.vlgmr.msra.gmra.mxu2 %vm483_vm2, %v451_v40  ;;  %v430_v16 = vsel %vm425_vm0, %v285_v11, %v322_v5 }
  0x90   : > { %1366 = vmatmul.msk.f32.vlgmr.msra.gmra.mxu1 %vm483_vm2, %v443_v2  ;;  %1374 = vmatmul.msk.f32.vlgmr.msra.gmra.mxu3 %vm483_vm2, %v451_v40  ;;  %v296_v40 = vmul.f32 %v1718_v63, %v1718_v63 }
  0x93   : > { %v334_v43 = vpop.permute.xlu0 %333 }
  0x94   : > { %v1433_v44 = vpop.permute.xlu1 %1432  ;;  %v436_v54 = vsel %vm425_vm0, %v291_v48, %v334_v43 }
  0x95   : > { %v1435_v52 = vunpack.i.h.bf16 %v1433_v44  ;;  %v1434_v53 = vunpack.i.l.bf16 %v1433_v44 }
  0x96   : > { %v324_v17 = vpop.permute.xlu2 %323 }
  0x97   : > { %1351 = vmatmul.msk.f32.gmra.mxu0 %vm483_vm2, %v444_v45  ;;  %1359 = vmatmul.msk.f32.gmra.mxu2 %vm483_vm2, %v452_v46  ;;  %v445_v57 = vsel %vm442_vm1, %v428_v55, %v1435_v52  ;;  %v453_v27 = vsel %vm442_vm1, %v436_v54, %v1434_v53  ;;  %v431_v29 = vsel %vm425_vm0, %v286_v23, %v324_v17 }
  0x98   : > { %1367 = vmatmul.msk.f32.gmra.mxu1 %vm483_vm2, %v444_v45  ;;  %1375 = vmatmul.msk.f32.gmra.mxu3 %vm483_vm2, %v452_v46 }
  0x9b   : > { %v336_v56 = vpop.permute.xlu0 %335 }
  0x9c   : > { %v1438_v21 = vpop.permute.xlu1 %1437  ;;  %v437_v7 = vsel %vm425_vm0, %v292_v58, %v336_v56 }
  0x9d   : > { %v1440_v0 = vunpack.i.h.bf16 %v1438_v21  ;;  %v1439_v1 = vunpack.i.l.bf16 %v1438_v21 }
  0x9e   : > { %v326_v36 = vpop.permute.xlu2 %325 }
  0x9f   : > { %1352 = vmatmul.msk.f32.gmra.mxu0 %vm483_vm2, %v445_v57  ;;  %1360 = vmatmul.msk.f32.gmra.mxu2 %vm483_vm2, %v453_v27  ;;  %v446_v6 = vsel %vm442_vm1, %v429_v8, %v1440_v0  ;;  %v454_v34 = vsel %vm442_vm1, %v437_v7, %v1439_v1  ;;  %v432_v3 = vsel %vm425_vm0, %v287_v32, %v326_v36 }
  0xa0   : > { %1368 = vmatmul.msk.f32.gmra.mxu1 %vm483_vm2, %v445_v57  ;;  %1376 = vmatmul.msk.f32.gmra.mxu3 %vm483_vm2, %v453_v27 }
  0xa3   : > { %v338_v9 = vpop.permute.xlu0 %337 }
  0xa4   : > { %v1443_v28 = vpop.permute.xlu1 %1442  ;;  %v438_v15 = vsel %vm425_vm0, %v293_v10, %v338_v9 }
  0xa5   : > { %v1445_v12 = vunpack.i.h.bf16 %v1443_v28  ;;  %v1444_v14 = vunpack.i.l.bf16 %v1443_v28 }
  0xa6   : > { %v328_v42 = vpop.permute.xlu2 %327 }
  0xa7   : > { %1353 = vmatmul.msk.f32.gmra.mxu0 %vm483_vm2, %v446_v6  ;;  %1361 = vmatmul.msk.f32.gmra.mxu2 %vm483_vm2, %v454_v34  ;;  %v447_v19 = vsel %vm442_vm1, %v430_v16, %v1445_v12  ;;  %v455_v47 = vsel %vm442_vm1, %v438_v15, %v1444_v14  ;;  %v433_v43 = vsel %vm425_vm0, %v288_v41, %v328_v42 }
  0xa8   : > { %1369 = vmatmul.msk.f32.gmra.mxu1 %vm483_vm2, %v446_v6  ;;  %1377 = vmatmul.msk.f32.gmra.mxu3 %vm483_vm2, %v454_v34 }
  0xab   : > { %v340_v18 = vpop.permute.xlu0 %339 }
  0xac   : > { %v1448_v35 = vpop.permute.xlu1 %1447  ;;  %v439_v26 = vsel %vm425_vm0, %v294_v22, %v340_v18 }
  0xad   : > { %v1450_v24 = vunpack.i.h.bf16 %v1448_v35  ;;  %v1449_v25 = vunpack.i.l.bf16 %v1448_v35 }
  0xaf   : > { %1354 = vmatmul.msk.f32.gmra.mxu0 %vm483_vm2, %v447_v19  ;;  %1362 = vmatmul.msk.f32.gmra.mxu2 %vm483_vm2, %v455_v47  ;;  %v448_v49 = vsel %vm442_vm1, %v431_v29, %v1450_v24  ;;  %v456_v31 = vsel %vm442_vm1, %v439_v26, %v1449_v25 }
  0xb0   : > { %1370 = vmatmul.msk.f32.gmra.mxu1 %vm483_vm2, %v447_v19  ;;  %1378 = vmatmul.msk.f32.gmra.mxu3 %vm483_vm2, %v455_v47 }
  0xb3   : > { %v342_v30 = vpop.permute.xlu0 %341 }
  0xb4   : > { %v1453_v33 = vpop.permute.xlu1 %1452  ;;  %v440_v39 = vsel %vm425_vm0, %v295_v59, %v342_v30 }
  0xb5   : > { %v1455_v37 = vunpack.i.h.bf16 %v1453_v33  ;;  %v1454_v38 = vunpack.i.l.bf16 %v1453_v33 }
  0xb7   : > { %1355 = vmatmul.msk.f32.gmra.mxu0 %vm483_vm2, %v448_v49  ;;  %1363 = vmatmul.msk.f32.gmra.mxu2 %vm483_vm2, %v456_v31  ;;  %v449_v2 = vsel %vm442_vm1, %v432_v3, %v1455_v37  ;;  %v457_v62 = vsel %vm442_vm1, %v440_v39, %v1454_v38 }
  0xb8   : > { %1371 = vmatmul.msk.f32.gmra.mxu1 %vm483_vm2, %v448_v49  ;;  %1379 = vmatmul.msk.f32.gmra.mxu3 %vm483_vm2, %v456_v31 }
  0xbb   : > { %v344_v60 = vpop.permute.xlu0 %343 }
  0xbc   : > { %v441_v13 = vsel %vm425_vm0, %v296_v40, %v344_v60  ;;  %v408_v20 = vpop.permute.xlu1 %407 }
  0xbd   : > { %v458_v63 = vsel %vm442_vm1, %v441_v13, %v408_v20 }
  0xbf   : > { %1356 = vmatmul.msk.f32.gmra.mxu0 %vm483_vm2, %v449_v2  ;;  %1364 = vmatmul.msk.f32.gmra.mxu2 %vm483_vm2, %v457_v62 }
  0xc0   : > { %1372 = vmatmul.msk.f32.gmra.mxu1 %vm483_vm2, %v449_v2  ;;  %1380 = vmatmul.msk.f32.gmra.mxu3 %vm483_vm2, %v457_v62 }
  0xc3   : > { %v392_v44 = vpop.permute.xlu0 %391 }
  0xc4   : > { %v450_v4 = vsel %vm442_vm1, %v433_v43, %v392_v44  ;;  %v1875_v45 = vpop.permute.xlu1 %697 }
  0xc7   : > { %1365 = vmatmul.msk.f32.gmra.mxu2 %vm483_vm2, %v458_v63  ;;  %1357 = vmatmul.msk.f32.gmra.mxu0 %vm483_vm2, %v450_v4 }
  0xc8   : > { %1373 = vmatmul.msk.f32.gmra.mxu1 %vm483_vm2, %v450_v4  ;;  %1381 = vmatmul.msk.f32.gmra.mxu3 %vm483_vm2, %v458_v63 }
 0x10c   : > { %v549_v46 = vpop.f32.mrf.mxu0 }
 0x10d   : > { %662 = vst [vmem:[%s1873_s7] sm:$0xff] %v549_v46  ;;  %v614_v48 = vpop.f32.mrf.mxu1 }
 0x10e   : > { %663 = vst.msk [vmem:[%s1873_s7 + $0x8] sm:$0xff] %vm425_vm0, %v614_v48  ;;  %v1881_v50 = vadd.f32 %v1875_v45, %v614_v48 }
 0x110   : > { %v717_v51 = vsel %vm716_vm3, %v1881_v50, -inf }
 0x111   : > { %718 = vmax.xlane.f32.xlu2 %v717_v51 }
 0x112   : > { %v573_v52 = vpop.f32.mrf.mxu2 }
 0x113   : > { %678 = vst [vmem:[%s1873_s7 + $0x80] sm:$0xff] %v573_v52  ;;  %v638_v53 = vpop.f32.mrf.mxu3 }
 0x114   : > { %679 = vst.msk [vmem:[%s1873_s7 + $0x88] sm:$0xff] %vm425_vm0, %v638_v53  ;;  %v1889_v54 = vadd.f32 %v1875_v45, %v638_v53  ;;  %v552_v55 = vpop.f32.mrf.mxu0 }
 0x115   : > { %664 = vst [vmem:[%s1873_s7 + $0x10] sm:$0xff] %v552_v55  ;;  %v617_v56 = vpop.f32.mrf.mxu1 }
 0x116   : > { %665 = vst.msk [vmem:[%s1873_s7 + $0x18] sm:$0xff] %vm425_vm0, %v617_v56  ;;  %v741_v21 = vsel %vm716_vm3, %v1889_v54, -inf  ;;  %v1897_v57 = vadd.f32 %v1875_v45, %v617_v56 }
 0x117   : > { %742 = vmax.xlane.f32.xlu0 %v741_v21 }
 0x118   : > { %v720_v5 = vsel %vm716_vm3, %v1897_v57, -inf }
 0x11a   : > { %v576_v27 = vpop.f32.mrf.mxu2 }
 0x11b   : > { %680 = vst [vmem:[%s1873_s7 + $0x90] sm:$0xff] %v576_v27  ;;  %v641_v58 = vpop.f32.mrf.mxu3 }
 0x11c   : > { %681 = vst.msk [vmem:[%s1873_s7 + $0x98] sm:$0xff] %vm425_vm0, %v641_v58  ;;  %v1903_v61 = vadd.f32 %v1875_v45, %v641_v58  ;;  %v555_v0 = vpop.f32.mrf.mxu0 }
 0x11d   : > { %666 = vst [vmem:[%s1873_s7 + $0x20] sm:$0xff] %v555_v0  ;;  %v620_v1 = vpop.f32.mrf.mxu1 }
 0x11e   : > { %667 = vst.msk [vmem:[%s1873_s7 + $0x28] sm:$0xff] %vm425_vm0, %v620_v1  ;;  %v744_v7 = vsel %vm716_vm3, %v1903_v61, -inf  ;;  %v1913_v8 = vadd.f32 %v1875_v45, %v620_v1 }
 0x11f   : > { %721 = vmax.xlane.f32.xlu0 %v720_v5  ;;  %745 = vmax.xlane.f32.xlu1 %v744_v7 }
 0x120   : > { %v723_v11 = vsel %vm716_vm3, %v1913_v8, -inf }
 0x122   : > { %v579_v9 = vpop.f32.mrf.mxu2 }
 0x123   : > { %682 = vst [vmem:[%s1873_s7 + $0xa0] sm:$0xff] %v579_v9  ;;  %v644_v28 = vpop.f32.mrf.mxu3 }
 0x124   : > { %683 = vst.msk [vmem:[%s1873_s7 + $0xa8] sm:$0xff] %vm425_vm0, %v644_v28  ;;  %v1919_v6 = vadd.f32 %v1875_v45, %v644_v28  ;;  %v558_v34 = vpop.f32.mrf.mxu0 }
 0x125   : > { %668 = vst [vmem:[%s1873_s7 + $0x30] sm:$0xff] %v558_v34  ;;  %v623_v10 = vpop.f32.mrf.mxu1 }
 0x126   : > { %669 = vst.msk [vmem:[%s1873_s7 + $0x38] sm:$0xff] %vm425_vm0, %v623_v10  ;;  %v747_v12 = vsel %vm716_vm3, %v1919_v6, -inf  ;;  %v1929_v14 = vadd.f32 %v1875_v45, %v623_v10 }
 0x127   : > { %724 = vmax.xlane.f32.xlu1 %v723_v11  ;;  %748 = vmax.xlane.f32.xlu2 %v747_v12 }
 0x128   : > { %v726_v19 = vsel %vm716_vm3, %v1929_v14, -inf }
 0x12a   : > { %v582_v15 = vpop.f32.mrf.mxu2 }
 0x12b   : > { %684 = vst [vmem:[%s1873_s7 + $0xb0] sm:$0xff] %v582_v15  ;;  %v647_v16 = vpop.f32.mrf.mxu3 }
 0x12c   : > { %685 = vst.msk [vmem:[%s1873_s7 + $0xb8] sm:$0xff] %vm425_vm0, %v647_v16  ;;  %v1935_v17 = vadd.f32 %v1875_v45, %v647_v16  ;;  %v561_v18 = vpop.f32.mrf.mxu0 }
 0x12d   : > { %670 = vst [vmem:[%s1873_s7 + $0x40] sm:$0xff] %v561_v18  ;;  %v626_v35 = vpop.f32.mrf.mxu1 }
 0x12e   : > { %671 = vst.msk [vmem:[%s1873_s7 + $0x48] sm:$0xff] %vm425_vm0, %v626_v35  ;;  %v750_v47 = vsel %vm716_vm3, %v1935_v17, -inf  ;;  %v1945_v22 = vadd.f32 %v1875_v45, %v626_v35 }
 0x12f   : > { %727 = vmax.xlane.f32.xlu2 %v726_v19  ;;  %751 = vmax.xlane.f32.xlu0 %v750_v47 }
 0x130   : > { %v729_v49 = vsel %vm716_vm3, %v1945_v22, -inf }
 0x132   : > { %v585_v23 = vpop.f32.mrf.mxu2 }
 0x133   : > { %686 = vst [vmem:[%s1873_s7 + $0xc0] sm:$0xff] %v585_v23  ;;  %v650_v24 = vpop.f32.mrf.mxu3 }
 0x134   : > { %687 = vst.msk [vmem:[%s1873_s7 + $0xc8] sm:$0xff] %vm425_vm0, %v650_v24  ;;  %v1951_v25 = vadd.f32 %v1875_v45, %v650_v24  ;;  %v564_v26 = vpop.f32.mrf.mxu0 }
 0x135   : > { %672 = vst [vmem:[%s1873_s7 + $0x50] sm:$0xff] %v564_v26  ;;  %v629_v29 = vpop.f32.mrf.mxu1 }
 0x136   : > { %673 = vst.msk [vmem:[%s1873_s7 + $0x58] sm:$0xff] %vm425_vm0, %v629_v29  ;;  %v1957_v30 = vadd.f32 %v1875_v45, %v629_v29  ;;  %v753_v31 = vsel %vm716_vm3, %v1951_v25, -inf }
 0x137   : > { %730 = vmax.xlane.f32.xlu2 %v729_v49  ;;  %754 = vmax.xlane.f32.xlu1 %v753_v31 }
 0x138   : > { %v732_v59 = vsel %vm716_vm3, %v1957_v30, -inf }
 0x139   : > { %733 = vmax.xlane.f32.xlu0 %v732_v59 }
 0x13a   : > { %v588_v32 = vpop.f32.mrf.mxu2 }
 0x13b   : > { %688 = vst [vmem:[%s1873_s7 + $0xd0] sm:$0xff] %v588_v32  ;;  %v653_v33 = vpop.f32.mrf.mxu3 }
 0x13c   : > { %689 = vst.msk [vmem:[%s1873_s7 + $0xd8] sm:$0xff] %vm425_vm0, %v653_v33  ;;  %v1969_v36 = vadd.f32 %v1875_v45, %v653_v33  ;;  %v567_v37 = vpop.f32.mrf.mxu0 }
 0x13d   : > { %674 = vst [vmem:[%s1873_s7 + $0x60] sm:$0xff] %v567_v37  ;;  %v632_v38 = vpop.f32.mrf.mxu1 }
 0x13e   : > { %675 = vst.msk [vmem:[%s1873_s7 + $0x68] sm:$0xff] %vm425_vm0, %v632_v38  ;;  %v1975_v39 = vadd.f32 %v1875_v45, %v632_v38  ;;  %v756_v3 = vsel %vm716_vm3, %v1969_v36, -inf }
 0x13f   : > { %757 = vmax.xlane.f32.xlu2 %v756_v3 }
 0x140   : > { %v735_v60 = vsel %vm716_vm3, %v1975_v39, -inf }
 0x141   : > { %736 = vmax.xlane.f32.xlu1 %v735_v60 }
 0x142   : > { %v591_v2 = vpop.f32.mrf.mxu2 }
 0x143   : > { %690 = vst [vmem:[%s1873_s7 + $0xe0] sm:$0xff] %v591_v2  ;;  %v656_v62 = vpop.f32.mrf.mxu3 }
 0x144   : > { %691 = vst.msk [vmem:[%s1873_s7 + $0xe8] sm:$0xff] %vm425_vm0, %v656_v62  ;;  %v1985_v40 = vadd.f32 %v1875_v45, %v656_v62  ;;  %v570_v41 = vpop.f32.mrf.mxu0 }
 0x145   : > { %v635_v42 = vpop.f32.mrf.mxu1  ;;  %676 = vst [vmem:[%s1873_s7 + $0x70] sm:$0xff] %v570_v41 }
 0x146   : > { %677 = vst.msk [vmem:[%s1873_s7 + $0x78] sm:$0xff] %vm425_vm0, %v635_v42  ;;  %v1991_v13 = vadd.f32 %v1875_v45, %v635_v42  ;;  %v759_v20 = vsel %vm716_vm3, %v1985_v40, -inf }
 0x147   : > { %760 = vmax.xlane.f32.xlu0 %v759_v20 }
 0x148   : > { %v738_v43 = vsel %vm716_vm3, %v1991_v13, -inf }
 0x149   : > { %739 = vmax.xlane.f32.xlu2 %v738_v43 }
 0x14a   : > { %v594_v44 = vpop.f32.mrf.mxu2 }
 0x14b   : > { %692 = vst [vmem:[%s1873_s7 + $0xf0] sm:$0xff] %v594_v44  ;;  %v659_v63 = vpop.f32.mrf.mxu3 }
 0x14c   : > { %693 = vst.msk [vmem:[%s1873_s7 + $0xf8] sm:$0xff] %vm425_vm0, %v659_v63  ;;  %v2001_v4 = vadd.f32 %v1875_v45, %v659_v63 }
 0x14e   : > { %v762_v46 = vsel %vm716_vm3, %v2001_v4, -inf }
 0x14f   : > { %763 = vmax.xlane.f32.xlu1 %v762_v46 }
 0x184   : > { %v719_v48 = vpop.xlane.xlu2 %718 }
 0x185   : > { %v765_v51 = vsub.f32 %v1881_v50, %v719_v48 }
 0x187   : > { %v781_v52 = vmul.f32 1.442695, %v765_v51 }
 0x189   : > { %1457 = vpow2.f32 %v781_v52 }
 0x18a   : > { %v743_v53 = vpop.xlane.xlu0 %742 }
 0x18b   : > { %v773_v55 = vsub.f32 %v1889_v54, %v743_v53 }
 0x18d   : > { %v797_v56 = vmul.f32 1.442695, %v773_v55 }
 0x18f   : > { %v2007_v21 = vpop.eup %1457  ;;  %1459 = vpow2.f32 %v797_v56 }
 0x190   : > { %829 = vrot.lane.b32.xlu2 %v2007_v21, %s1532_s8 }
 0x192   : > { %v722_v45 = vpop.xlane.xlu0 %721  ;;  %v746_v27 = vpop.xlane.xlu1 %745 }
 0x193   : > { %v766_v58 = vsub.f32 %v1897_v57, %v722_v45  ;;  %v774_v1 = vsub.f32 %v1903_v61, %v746_v27 }
 0x195   : > { %v2012_v0 = vpop.eup %1459  ;;  %v783_v50 = vmul.f32 1.442695, %v766_v58  ;;  %v799_v54 = vmul.f32 1.442695, %v774_v1 }
 0x196   : > { %845 = vrot.lane.b32.xlu1 %v2012_v0, %s1532_s8 }
 0x197   : > { %1461 = vpow2.f32 %v783_v50 }
 0x198   : > { %1463 = vpow2.f32 %v799_v54 }
 0x19a   : > { %v725_v5 = vpop.xlane.xlu1 %724  ;;  %v749_v7 = vpop.xlane.xlu2 %748 }
 0x19b   : > { %v767_v9 = vsub.f32 %v1913_v8, %v725_v5  ;;  %v775_v28 = vsub.f32 %v1919_v6, %v749_v7 }
 0x19d   : > { %v2019_v34 = vpop.eup %1461  ;;  %v785_v10 = vmul.f32 1.442695, %v767_v9  ;;  %v801_v57 = vmul.f32 1.442695, %v775_v28 }
 0x19e   : > { %831 = vrot.lane.b32.xlu0 %v2019_v34, %s1532_s8  ;;  %v2025_v16 = vpop.eup %1463 }
 0x19f   : > { %1465 = vpow2.f32 %v785_v10 }
 0x1a0   : > { %1467 = vpow2.f32 %v801_v57 }
 0x1a2   : > { %v728_v61 = vpop.xlane.xlu2 %727  ;;  %v752_v11 = vpop.xlane.xlu0 %751 }
 0x1a3   : > { %v768_v12 = vsub.f32 %v1929_v14, %v728_v61  ;;  %v776_v15 = vsub.f32 %v1935_v17, %v752_v11 }
 0x1a5   : > { %v2027_v8 = vpop.eup %1465  ;;  %v787_v6 = vmul.f32 1.442695, %v768_v12  ;;  %v803_v18 = vmul.f32 1.442695, %v776_v15 }
 0x1a6   : > { %v2029_v35 = vpop.eup %1467  ;;  %847 = vrot.lane.b32.xlu0 %v2025_v16, %s1532_s8  ;;  %833 = vrot.lane.b32.xlu1 %v2027_v8, %s1532_s8 }
 0x1a7   : > { %1469 = vpow2.f32 %v787_v6  ;;  %849 = vrot.lane.b32.xlu2 %v2029_v35, %s1532_s8 }
 0x1a8   : > { %1471 = vpow2.f32 %v803_v18 }
 0x1aa   : > { %v731_v14 = vpop.xlane.xlu2 %730  ;;  %v755_v17 = vpop.xlane.xlu1 %754 }
 0x1ab   : > { %v769_v19 = vsub.f32 %v1945_v22, %v731_v14  ;;  %v777_v47 = vsub.f32 %v1951_v25, %v755_v17 }
 0x1ac   : > { %v734_v23 = vpop.xlane.xlu0 %733 }
 0x1ad   : > { %v2039_v24 = vpop.eup %1469  ;;  %v789_v26 = vmul.f32 1.442695, %v769_v19  ;;  %v805_v29 = vmul.f32 1.442695, %v777_v47  ;;  %v770_v49 = vsub.f32 %v1957_v30, %v734_v23 }
 0x1ae   : > { %v2042_v31 = vpop.eup %1471  ;;  %835 = vrot.lane.b32.xlu0 %v2039_v24, %s1532_s8 }
 0x1af   : > { %1473 = vpow2.f32 %v789_v26  ;;  %v791_v59 = vmul.f32 1.442695, %v770_v49  ;;  %851 = vrot.lane.b32.xlu1 %v2042_v31, %s1532_s8 }
 0x1b0   : > { %1475 = vpow2.f32 %v805_v29 }
 0x1b1   : > { %1477 = vpow2.f32 %v791_v59 }
 0x1b2   : > { %v758_v22 = vpop.xlane.xlu2 %757 }
 0x1b3   : > { %v778_v25 = vsub.f32 %v1969_v36, %v758_v22 }
 0x1b4   : > { %v737_v32 = vpop.xlane.xlu1 %736 }
 0x1b5   : > { %v2049_v33 = vpop.eup %1473  ;;  %v807_v37 = vmul.f32 1.442695, %v778_v25  ;;  %v771_v30 = vsub.f32 %v1975_v39, %v737_v32 }
 0x1b6   : > { %v2052_v38 = vpop.eup %1475  ;;  %837 = vrot.lane.b32.xlu2 %v2049_v33, %s1532_s8 }
 0x1b7   : > { %v2056_v3 = vpop.eup %1477  ;;  %1479 = vpow2.f32 %v807_v37  ;;  %v793_v60 = vmul.f32 1.442695, %v771_v30  ;;  %853 = vrot.lane.b32.xlu0 %v2052_v38, %s1532_s8 }
 0x1b8   : > { %839 = vrot.lane.b32.xlu1 %v2056_v3, %s1532_s8 }
 0x1b9   : > { %1481 = vpow2.f32 %v793_v60 }
 0x1ba   : > { %v761_v36 = vpop.xlane.xlu0 %760 }
 0x1bb   : > { %v779_v2 = vsub.f32 %v1985_v40, %v761_v36 }
 0x1bc   : > { %v740_v39 = vpop.xlane.xlu2 %739 }
 0x1bd   : > { %v2063_v62 = vpop.eup %1479  ;;  %v809_v41 = vmul.f32 1.442695, %v779_v2  ;;  %v772_v42 = vsub.f32 %v1991_v13, %v740_v39 }
 0x1be   : > { %855 = vrot.lane.b32.xlu2 %v2063_v62, %s1532_s8 }
 0x1bf   : > { %v2068_v20 = vpop.eup %1481  ;;  %1483 = vpow2.f32 %v809_v41  ;;  %v795_v43 = vmul.f32 1.442695, %v772_v42 }
 0x1c0   : > { %841 = vrot.lane.b32.xlu0 %v2068_v20, %s1532_s8 }
 0x1c1   : > { %1485 = vpow2.f32 %v795_v43 }
 0x1c2   : > { %v764_v44 = vpop.xlane.xlu1 %763 }
 0x1c3   : > { %v780_v40 = vsub.f32 %v2001_v4, %v764_v44 }
 0x1c5   : > { %v2073_v63 = vpop.eup %1483  ;;  %v811_v46 = vmul.f32 1.442695, %v780_v40 }
 0x1c6   : > { %857 = vrot.lane.b32.xlu1 %v2073_v63, %s1532_s8 }
 0x1c7   : > { %v2077_v13 = vpop.eup %1485  ;;  %1487 = vpow2.f32 %v811_v46 }
 0x1c8   : > { %843 = vrot.lane.b32.xlu2 %v2077_v13, %s1532_s8 }
 0x1cd   : > { %v2081_v48 = vpop.eup %1487 }
 0x1ce   : > { %859 = vrot.lane.b32.xlu0 %v2081_v48, %s1532_s8 }
 0x1ea   : > { %v830_v51 = vpop.permute.xlu2 %829 }
 0x1eb   : > { %v878_v4 = vsel %vm877_vm4, %v830_v51, 0.0 }
 0x1f1   : > { %879 = vadd.xlane.f32.xlu2 %v878_v4 }
 0x201   : > { %v850_v45 = vpop.permute.xlu2 %849 }
 0x202   : > { %v908_v1 = vsel %vm877_vm4, %v850_v45, 0.0 }
 0x208   : > { %v846_v52 = vpop.permute.xlu1 %845 }
 0x209   : > { %v902_v53 = vsel %vm877_vm4, %v846_v52, 0.0 }
 0x20a   : > { %903 = vadd.xlane.f32.xlu0 %v902_v53 }
 0x210   : > { %v832_v55 = vpop.permute.xlu0 %831  ;;  %v838_v5 = vpop.permute.xlu2 %837 }
 0x211   : > { %v881_v56 = vsel %vm877_vm4, %v832_v55, 0.0  ;;  %v890_v10 = vsel %vm877_vm4, %v838_v5, 0.0 }
 0x212   : > { %882 = vadd.xlane.f32.xlu1 %v881_v56 }
 0x218   : > { %v848_v27 = vpop.permute.xlu0 %847  ;;  %v834_v58 = vpop.permute.xlu1 %833 }
 0x219   : > { %v905_v50 = vsel %vm877_vm4, %v848_v27, 0.0  ;;  %v884_v54 = vsel %vm877_vm4, %v834_v58, 0.0  ;;  %v856_v61 = vpop.permute.xlu2 %855 }
 0x21a   : > { %906 = vadd.xlane.f32.xlu2 %v905_v50  ;;  %909 = vadd.xlane.f32.xlu1 %v908_v1  ;;  %v917_v12 = vsel %vm877_vm4, %v856_v61, 0.0 }
 0x21b   : > { %885 = vadd.xlane.f32.xlu0 %v884_v54 }
 0x220   : > { %v836_v7 = vpop.permute.xlu0 %835 }
 0x221   : > { %v852_v9 = vpop.permute.xlu1 %851  ;;  %v887_v28 = vsel %vm877_vm4, %v836_v7, 0.0 }
 0x222   : > { %888 = vadd.xlane.f32.xlu2 %v887_v28  ;;  %891 = vadd.xlane.f32.xlu1 %v890_v10  ;;  %v911_v57 = vsel %vm877_vm4, %v852_v9, 0.0  ;;  %v844_v14 = vpop.permute.xlu2 %843 }
 0x223   : > { %912 = vadd.xlane.f32.xlu0 %v911_v57  ;;  %v899_v17 = vsel %vm877_vm4, %v844_v14, 0.0 }
 0x229   : > { %v854_v11 = vpop.permute.xlu0 %853 }
 0x22a   : > { %v914_v15 = vsel %vm877_vm4, %v854_v11, 0.0  ;;  %918 = vadd.xlane.f32.xlu1 %v917_v12  ;;  %v840_v6 = vpop.permute.xlu1 %839 }
 0x22b   : > { %915 = vadd.xlane.f32.xlu2 %v914_v15  ;;  %v893_v18 = vsel %vm877_vm4, %v840_v6, 0.0 }
 0x22c   : > { %894 = vadd.xlane.f32.xlu0 %v893_v18 }
 0x232   : > { %v842_v19 = vpop.permute.xlu0 %841  ;;  %900 = vadd.xlane.f32.xlu1 %v899_v17 }
 0x233   : > { %v896_v47 = vsel %vm877_vm4, %v842_v19, 0.0 }
 0x234   : > { %897 = vadd.xlane.f32.xlu2 %v896_v47 }
 0x238   : > { %v858_v23 = vpop.permute.xlu1 %857 }
 0x239   : > { %v920_v26 = vsel %vm877_vm4, %v858_v23, 0.0 }
 0x23a   : > { %921 = vadd.xlane.f32.xlu0 %v920_v26 }
 0x240   : > { %v860_v29 = vpop.permute.xlu0 %859 }
 0x241   : > { %v923_v49 = vsel %vm877_vm4, %v860_v29, 0.0 }
 0x242   : > { %924 = vadd.xlane.f32.xlu2 %v923_v49 }
 0x264   : > { %v880_v59 = vpop.xlane.xlu2 %879 }
 0x265   : > { %1489 = vrcp.f32 %v880_v59  ;;  %v937_v37 = vand.u32 2147483648, %v880_v59  ;;  %v935_v60 = vand.u32 2147483647, %v880_v59  ;;  %vm931_vm6 = vweird.f32 %v880_v59 }
 0x267   : > { %v938_v2 = vor.u32 1.1754944e-38, %v937_v37  ;;  %vm936_vm8 = vcmp.eq.f32.partialorder %v935_v60, 8.507059e+37 }
 0x26b   : > { %v1490_v22 = vpop.eup %1489 }
 0x26c   : > { %v927_v25 = vmul.f32 %v1490_v22, %v880_v59  ;;  %vm932_vm5 = vweird.f32 %v1490_v22 }
 0x26d   : > { %vm933_vm7 = vmor %vm931_vm6, %vm932_vm5 }
 0x26e   : > { %v928_v32 = vsub.f32 1.0, %v927_v25 }
 0x270   : > { %v929_v30 = vmul.f32 %v1490_v22, %v928_v32 }
 0x272   : > { %v930_v36 = vadd.f32 %v1490_v22, %v929_v30 }
 0x274   : > { %v934_v39 = vsel %vm933_vm7, %v1490_v22, %v930_v36 }
 0x275   : > { %v939_v41 = vsel %vm936_vm8, %v938_v2, %v934_v39 }
 0x276   : > { %v940_v42 = vmul.f32 %v2007_v21, %v939_v41 }
 0x278   : > { %1182 = vrot.lane.b32.xlu1 %v940_v42, %s1532_s8 }
 0x27d   : > { %v904_v43 = vpop.xlane.xlu0 %903 }
 0x27e   : > { %1491 = vrcp.f32 %v904_v43  ;;  %v1057_v52 = vand.u32 2147483648, %v904_v43  ;;  %vm1051_vm10 = vweird.f32 %v904_v43  ;;  %v1055_v55 = vand.u32 2147483647, %v904_v43 }
 0x280   : > { %v1058_v50 = vor.u32 1.1754944e-38, %v1057_v52  ;;  %vm1056_vm12 = vcmp.eq.f32.partialorder %v1055_v55, 8.507059e+37 }
 0x284   : > { %v1492_v44 = vpop.eup %1491 }
 0x285   : > { %v1047_v40 = vmul.f32 %v1492_v44, %v904_v43  ;;  %v883_v46 = vpop.xlane.xlu1 %882  ;;  %vm1052_vm9 = vweird.f32 %v1492_v44 }
 0x286   : > { %1493 = vrcp.f32 %v883_v46  ;;  %vm1053_vm11 = vmor %vm1051_vm10, %vm1052_vm9  ;;  %v952_v5 = vand.u32 2147483648, %v883_v46  ;;  %v950_v9 = vand.u32 2147483647, %v883_v46  ;;  %vm946_vm14 = vweird.f32 %v883_v46 }
 0x287   : > { %v1048_v51 = vsub.f32 1.0, %v1047_v40 }
 0x288   : > { %v953_v11 = vor.u32 1.1754944e-38, %v952_v5  ;;  %vm2116_vm15 = vcmp.eq.f32.partialorder %v950_v9, 8.507059e+37 }
 0x289   : > { %v1049_v4 = vmul.f32 %v1492_v44, %v1048_v51 }
 0x28b   : > { %v1050_v53 = vadd.f32 %v1492_v44, %v1049_v4 }
 0x28c   : > { %v1494_v56 = vpop.eup %1493 }
 0x28d   : > { %v942_v45 = vmul.f32 %v1494_v56, %v883_v46  ;;  %v2103_v27 = vpop.xlane.xlu2 %906  ;;  %v2105_v21 = vpop.xlane.xlu1 %909  ;;  %v1054_v58 = vsel %vm1053_vm11, %v1492_v44, %v1050_v53  ;;  %vm947_vm13 = vweird.f32 %v1494_v56 }
 0x28e   : > { %1495 = vrcp.f32 %v2103_v27  ;;  %v2108_v1 = vpop.xlane.xlu0 %885  ;;  %v1059_v7 = vsel %vm1056_vm12, %v1058_v50, %v1054_v58  ;;  %vm1066_vm0 = vweird.f32 %v2103_v27  ;;  %v1087_v23 = vand.u32 2147483648, %v2105_v21  ;;  %vm2141_vm1 = vmor %vm946_vm14, %vm947_vm13 }
 0x28f   : > { %v943_v54 = vsub.f32 1.0, %v942_v45  ;;  %1497 = vrcp.f32 %v2108_v1  ;;  %v1060_v10 = vmul.f32 %v2012_v0, %v1059_v7  ;;  %v1072_v0 = vand.u32 2147483648, %v2103_v27 }
 0x290   : > { %1499 = vrcp.f32 %v2105_v21  ;;  %v967_v18 = vand.u32 2147483648, %v2108_v1  ;;  %v965_v49 = vand.u32 2147483647, %v2108_v1  ;;  %v1070_v37 = vand.u32 2147483647, %v2103_v27 }
 0x291   : > { %v944_v28 = vmul.f32 %v1494_v56, %v943_v54  ;;  %1198 = vrot.lane.b32.xlu2 %v1060_v10, %s1532_s8  ;;  %v1085_v30 = vand.u32 2147483647, %v2105_v21  ;;  %vm961_vm2 = vweird.f32 %v2108_v1  ;;  %v1073_v39 = vor.u32 1.1754944e-38, %v1072_v0 }
 0x292   : > { %v968_v42 = vor.u32 1.1754944e-38, %v967_v18  ;;  %vm1081_vm3 = vweird.f32 %v2105_v21  ;;  %v1088_v44 = vor.u32 1.1754944e-38, %v1087_v23  ;;  %vm2167_vm6 = vcmp.eq.f32.partialorder %v965_v49, 8.507059e+37 }
 0x293   : > { %v945_v57 = vadd.f32 %v1494_v56, %v944_v28  ;;  %vm2171_vm7 = vcmp.eq.f32.partialorder %v1070_v37, 8.507059e+37  ;;  %vm2175_vm8 = vcmp.eq.f32.partialorder %v1085_v30, 8.507059e+37 }
 0x294   : > { %v2114_v61 = vpop.eup %1495 }
 0x295   : > { %v2120_v15 = vpop.eup %1497  ;;  %v1062_v6 = vmul.f32 %v2114_v61, %v2103_v27  ;;  %v2127_v14 = vpop.xlane.xlu2 %888  ;;  %v949_v25 = vsel %vm2141_vm1, %v1494_v56, %v945_v57  ;;  %vm1067_vm5 = vweird.f32 %v2114_v61 }
 0x296   : > { %v2129_v17 = vpop.xlane.xlu1 %891  ;;  %v2131_v19 = vpop.eup %1499  ;;  %v957_v47 = vmul.f32 %v2120_v15, %v2108_v1  ;;  %1501 = vrcp.f32 %v2127_v14  ;;  %v982_v2 = vand.u32 2147483648, %v2127_v14  ;;  %v954_v43 = vsel %vm2116_vm15, %v953_v11, %v949_v25  ;;  %vm2204_vm11 = vmor %vm1066_vm0, %vm1067_vm5 }
 0x297   : > { %v2137_v26 = vpop.xlane.xlu0 %912  ;;  %v1063_v59 = vsub.f32 1.0, %v1062_v6  ;;  %v1077_v22 = vmul.f32 %v2131_v19, %v2105_v21  ;;  %v955_v40 = vmul.f32 %v2019_v34, %v954_v43  ;;  %v997_v50 = vand.u32 2147483648, %v2129_v17 }
 0x298   : > { %1503 = vrcp.f32 %v2137_v26  ;;  %v958_v32 = vsub.f32 1.0, %v957_v47  ;;  %v2183_v45 = vor.u32 1.1754944e-38, %v982_v2  ;;  %vm1096_vm9 = vweird.f32 %v2137_v26 }
 0x299   : > { %1505 = vrcp.f32 %v2129_v17  ;;  %v1064_v60 = vmul.f32 %v2114_v61, %v1063_v59  ;;  %v1078_v36 = vsub.f32 1.0, %v1077_v22  ;;  %v1102_v58 = vand.u32 2147483648, %v2137_v26  ;;  %1184 = vrot.lane.b32.xlu0 %v955_v40, %s1532_s8 }
 0x29a   : > { %v959_v41 = vmul.f32 %v2120_v15, %v958_v32  ;;  %vm962_vm10 = vweird.f32 %v2120_v15  ;;  %vm976_vm12 = vweird.f32 %v2127_v14  ;;  %vm1082_vm13 = vweird.f32 %v2131_v19 }
 0x29b   : > { %v1065_v46 = vadd.f32 %v2114_v61, %v1064_v60  ;;  %v1079_v4 = vmul.f32 %v2131_v19, %v1078_v36  ;;  %v1103_v18 = vor.u32 1.1754944e-38, %v1102_v58  ;;  %v2220_v47 = vor.u32 1.1754944e-38, %v997_v50  ;;  %vm963_vm14 = vmor %vm961_vm2, %vm962_vm10 }
 0x29c   : > { %v2164_v51 = vpop.eup %1501  ;;  %v960_v28 = vadd.f32 %v2120_v15, %v959_v41  ;;  %v1100_v23 = vand.u32 2147483647, %v2137_v26  ;;  %v980_v29 = vand.u32 2147483647, %v2127_v14  ;;  %vm991_vm15 = vweird.f32 %v2129_v17  ;;  %vm1083_vm0 = vmor %vm1081_vm3, %vm1082_vm13 }
 0x29d   : > { %v972_v56 = vmul.f32 %v2164_v51, %v2127_v14  ;;  %v1069_v6 = vsel %vm2204_vm11, %v2114_v61, %v1065_v46  ;;  %v1080_v27 = vadd.f32 %v2131_v19, %v1079_v4  ;;  %vm977_vm1 = vweird.f32 %v2164_v51 }
 0x29e   : > { %v2179_v34 = vpop.eup %1503  ;;  %v2189_v54 = vpop.xlane.xlu1 %918  ;;  %v964_v59 = vsel %vm963_vm14, %v2120_v15, %v960_v28  ;;  %v1074_v22 = vsel %vm2171_vm7, %v1073_v39, %v1069_v6  ;;  %vm981_vm10 = vcmp.eq.f32.partialorder %v980_v29, 8.507059e+37 }
 0x29f   : > { %v2191_v5 = vpop.eup %1505  ;;  %v1092_v7 = vmul.f32 %v2179_v34, %v2137_v26  ;;  %v2195_v9 = vpop.xlane.xlu2 %915  ;;  %1507 = vrcp.f32 %v2189_v54  ;;  %v973_v57 = vsub.f32 1.0, %v972_v56  ;;  %v969_v1 = vsel %vm2167_vm6, %v968_v42, %v964_v59 }
 0x2a0   : > { %v987_v11 = vmul.f32 %v2191_v5, %v2129_v17  ;;  %1509 = vrcp.f32 %v2195_v9  ;;  %v2211_v12 = vpop.xlane.xlu0 %894  ;;  %v1075_v32 = vmul.f32 %v2025_v16, %v1074_v22  ;;  %v970_v15 = vmul.f32 %v2027_v8, %v969_v1 }
 0x2a1   : > { %v1093_v0 = vsub.f32 1.0, %v1092_v7  ;;  %1511 = vrcp.f32 %v2211_v12  ;;  %v974_v61 = vmul.f32 %v2164_v51, %v973_v57  ;;  %v1084_v30 = vsel %vm1083_vm0, %v2131_v19, %v1080_v27 }
 0x2a2   : > { %v988_v25 = vsub.f32 1.0, %v987_v11  ;;  %vm1097_vm2 = vweird.f32 %v2179_v34  ;;  %v1117_v2 = vand.u32 2147483648, %v2195_v9  ;;  %v1012_v21 = vand.u32 2147483648, %v2211_v12  ;;  %1200 = vrot.lane.b32.xlu0 %v1075_v32, %s1532_s8  ;;  %1186 = vrot.lane.b32.xlu2 %v970_v15, %s1532_s8 }
 0x2a3   : > { %v1094_v49 = vmul.f32 %v2179_v34, %v1093_v0  ;;  %v1089_v8 = vsel %vm2175_vm8, %v1088_v44, %v1084_v30  ;;  %vm2266_vm3 = vmor %vm1096_vm9, %vm1097_vm2  ;;  %v975_v44 = vadd.f32 %v2164_v51, %v974_v61  ;;  %v1132_v46 = vand.u32 2147483648, %v2189_v54 }
 0x2a4   : > { %v1090_v42 = vmul.f32 %v2029_v35, %v1089_v8  ;;  %v989_v40 = vmul.f32 %v2191_v5, %v988_v25  ;;  %vm1111_vm5 = vweird.f32 %v2195_v9  ;;  %vm1101_vm6 = vcmp.eq.f32.partialorder %v1100_v23, 8.507059e+37  ;;  %vm978_vm8 = vmor %vm976_vm12, %vm977_vm1 }
 0x2a5   : > { %v2238_v37 = vpop.eup %1507  ;;  %v1095_v60 = vadd.f32 %v2179_v34, %v1094_v49  ;;  %v1118_v53 = vor.u32 1.1754944e-38, %v1117_v2  ;;  %vm1006_vm7 = vweird.f32 %v2211_v12  ;;  %v1013_v56 = vor.u32 1.1754944e-38, %v1012_v21 }
 0x2a6   : > { %v2244_v36 = vpop.eup %1509  ;;  %v2249_v16 = vmul.f32 %v2238_v37, %v2189_v54  ;;  %v2255_v19 = vpop.xlane.xlu1 %900  ;;  %1202 = vrot.lane.b32.xlu1 %v1090_v42, %s1532_s8  ;;  %v979_v28 = vsel %vm978_vm8, %v2164_v51, %v975_v44  ;;  %v990_v57 = vadd.f32 %v2191_v5, %v989_v40  ;;  %vm992_vm11 = vweird.f32 %v2191_v5 }
 0x2a7   : > { %v2257_v39 = vpop.eup %1511  ;;  %v1107_v41 = vmul.f32 %v2244_v36, %v2195_v9  ;;  %1513 = vrcp.f32 %v2255_v19  ;;  %v2275_v52 = vpop.xlane.xlu2 %897  ;;  %v1099_v35 = vsel %vm2266_vm3, %v2179_v34, %v1095_v60  ;;  %vm1036_vm9 = vweird.f32 %v2255_v19  ;;  %vm2299_vm12 = vmor %vm991_vm15, %vm992_vm11 }
 0x2a8   : > { %v1002_v4 = vmul.f32 %v2257_v39, %v2211_v12  ;;  %1515 = vrcp.f32 %v2275_v52  ;;  %v1104_v58 = vsel %vm1101_vm6, %v1103_v18, %v1099_v35  ;;  %v1123_v50 = vsub.f32 1.0, %v2249_v16 }
 0x2a9   : > { %v1108_v26 = vsub.f32 1.0, %v1107_v41  ;;  %v1105_v7 = vmul.f32 %v2042_v31, %v1104_v58  ;;  %v984_v14 = vsel %vm981_vm10, %v2183_v45, %v979_v28  ;;  %v995_v31 = vand.u32 2147483647, %v2129_v17 }
 0x2aa   : > { %v1003_v55 = vsub.f32 1.0, %v1002_v4  ;;  %vm1112_vm13 = vweird.f32 %v2244_v36  ;;  %v985_v27 = vmul.f32 %v2039_v24, %v984_v14  ;;  %v994_v45 = vsel %vm2299_vm12, %v2191_v5, %v990_v57 }
 0x2ab   : > { %v1109_v34 = vmul.f32 %v2244_v36, %v1108_v26  ;;  %v1115_v23 = vand.u32 2147483647, %v2195_v9  ;;  %v1042_v61 = vand.u32 2147483648, %v2255_v19  ;;  %vm1021_vm14 = vweird.f32 %v2275_v52  ;;  %1204 = vrot.lane.b32.xlu2 %v1105_v7, %s1532_s8  ;;  %vm1113_vm0 = vmor %vm1111_vm5, %vm1112_vm13 }
 0x2ac   : > { %v1004_v10 = vmul.f32 %v2257_v39, %v1003_v55  ;;  %vm996_vm15 = vcmp.eq.f32.partialorder %v995_v31, 8.507059e+37  ;;  %1188 = vrot.lane.b32.xlu0 %v985_v27, %s1532_s8  ;;  %v1027_v59 = vand.u32 2147483648, %v2275_v52  ;;  %vm1007_vm2 = vweird.f32 %v2257_v39 }
 0x2ad   : > { %v1514_v11 = vpop.eup %1513  ;;  %v1110_v51 = vadd.f32 %v2244_v36, %v1109_v34  ;;  %v2311_v18 = vpop.xlane.xlu0 %921  ;;  %v999_v5 = vsel %vm996_vm15, %v2220_v47, %v994_v45  ;;  %vm1116_vm1 = vcmp.eq.f32.partialorder %v1115_v23, 8.507059e+37  ;;  %vm2332_vm3 = vmor %vm1006_vm7, %vm1007_vm2  ;;  %v1040_v30 = vand.u32 2147483647, %v2255_v19 }
 0x2ae   : > { %v1032_v0 = vmul.f32 %v1514_v11, %v2255_v19  ;;  %v1516_v29 = vpop.eup %1515  ;;  %1517 = vrcp.f32 %v2311_v18  ;;  %v1000_v22 = vmul.f32 %v2049_v33, %v999_v5  ;;  %v1005_v25 = vadd.f32 %v2257_v39, %v1004_v10 }
 0x2af   : > { %v1017_v17 = vmul.f32 %v1516_v29, %v2275_v52  ;;  %v1114_v49 = vsel %vm1113_vm0, %v2244_v36, %v1110_v51  ;;  %v1010_v33 = vand.u32 2147483647, %v2211_v12  ;;  %vm1037_vm5 = vweird.f32 %v1514_v11 }
 0x2b0   : > { %v1033_v24 = vsub.f32 1.0, %v1032_v0  ;;  %v1119_v9 = vsel %vm1116_vm1, %v1118_v53, %v1114_v49  ;;  %1190 = vrot.lane.b32.xlu1 %v1000_v22, %s1532_s8  ;;  %v1009_v36 = vsel %vm2332_vm3, %v2257_v39, %v1005_v25  ;;  %vm1022_vm6 = vweird.f32 %v1516_v29  ;;  %vm1038_vm8 = vmor %vm1036_vm9, %vm1037_vm5 }
 0x2b1   : > { %v1018_v32 = vsub.f32 1.0, %v1017_v17  ;;  %v1120_v15 = vmul.f32 %v2052_v38, %v1119_v9  ;;  %v1124_v38 = vmul.f32 %v2238_v37, %v1123_v50  ;;  %v1043_v21 = vor.u32 1.1754944e-38, %v1042_v61  ;;  %vm1023_vm11 = vmor %vm1021_vm14, %vm1022_vm6 }
 0x2b2   : > { %v1034_v1 = vmul.f32 %v1514_v11, %v1033_v24  ;;  %vm1011_vm7 = vcmp.eq.f32.partialorder %v1010_v33, 8.507059e+37  ;;  %v1025_v12 = vand.u32 2147483647, %v2275_v52  ;;  %v1028_v40 = vor.u32 1.1754944e-38, %v1027_v59 }
 0x2b3   : > { %v1019_v60 = vmul.f32 %v1516_v29, %v1018_v32  ;;  %v1014_v41 = vsel %vm1011_vm7, %v1013_v56, %v1009_v36  ;;  %vm1041_vm10 = vcmp.eq.f32.partialorder %v1040_v30, 8.507059e+37  ;;  %v1147_v26 = vand.u32 2147483648, %v2311_v18 }
 0x2b4   : > { %v1035_v2 = vadd.f32 %v1514_v11, %v1034_v1  ;;  %v1518_v16 = vpop.eup %1517  ;;  %v1015_v39 = vmul.f32 %v2056_v3, %v1014_v41  ;;  %1206 = vrot.lane.b32.xlu0 %v1120_v15, %s1532_s8  ;;  %vm1026_vm9 = vcmp.eq.f32.partialorder %v1025_v12, 8.507059e+37  ;;  %v1145_v56 = vand.u32 2147483647, %v2311_v18 }
 0x2b5   : > { %v1137_v8 = vmul.f32 %v1518_v16, %v2311_v18  ;;  %v925_v42 = vpop.xlane.xlu2 %924  ;;  %v1020_v44 = vadd.f32 %v1516_v29, %v1019_v60  ;;  %vm1142_vm12 = vweird.f32 %v1518_v16  ;;  %v1125_v52 = vadd.f32 %v2238_v37, %v1124_v38 }
 0x2b6   : > { %v1039_v43 = vsel %vm1038_vm8, %v1514_v11, %v1035_v2  ;;  %1519 = vrcp.f32 %v925_v42  ;;  %1192 = vrot.lane.b32.xlu2 %v1015_v39, %s1532_s8  ;;  %vm1126_vm13 = vweird.f32 %v2189_v54  ;;  %vm1127_vm14 = vweird.f32 %v2238_v37 }
 0x2b7   : > { %v1138_v4 = vsub.f32 1.0, %v1137_v8  ;;  %v1044_v19 = vsel %vm1041_vm10, %v1043_v21, %v1039_v43  ;;  %v1024_v35 = vsel %vm1023_vm11, %v1516_v29, %v1020_v44  ;;  %v1130_v58 = vand.u32 2147483647, %v2189_v54  ;;  %vm1128_vm0 = vmor %vm1126_vm13, %vm1127_vm14 }
 0x2b8   : > { %v1045_v53 = vmul.f32 %v2077_v13, %v1044_v19  ;;  %v1029_v55 = vsel %vm1026_vm9, %v1028_v40, %v1024_v35  ;;  %v1133_v34 = vor.u32 1.1754944e-38, %v1132_v46  ;;  %vm1141_vm15 = vweird.f32 %v2311_v18 }
 0x2b9   : > { %v1139_v3 = vmul.f32 %v1518_v16, %v1138_v4  ;;  %v1030_v13 = vmul.f32 %v2068_v20, %v1029_v55  ;;  %v1148_v28 = vor.u32 1.1754944e-38, %v1147_v26  ;;  %vm1143_vm1 = vmor %vm1141_vm15, %vm1142_vm12  ;;  %v1129_v10 = vsel %vm1128_vm0, %v2238_v37, %v1125_v52 }
 0x2ba   : > { %1196 = vrot.lane.b32.xlu1 %v1045_v53, %s1532_s8  ;;  %vm1131_vm2 = vcmp.eq.f32.partialorder %v1130_v58, 8.507059e+37  ;;  %vm1146_vm3 = vcmp.eq.f32.partialorder %v1145_v56, 8.507059e+37  ;;  %v1162_v46 = vand.u32 2147483648, %v925_v42  ;;  %v1160_v37 = vand.u32 2147483647, %v925_v42 }
 0x2bb   : > { %v1140_v50 = vadd.f32 %v1518_v16, %v1139_v3  ;;  %v1134_v14 = vsel %vm1131_vm2, %v1133_v34, %v1129_v10  ;;  %vm1156_vm6 = vweird.f32 %v925_v42 }
 0x2bc   : > { %v1520_v7 = vpop.eup %1519  ;;  %1194 = vrot.lane.b32.xlu0 %v1030_v13, %s1532_s8  ;;  %v1135_v20 = vmul.f32 %v2063_v62, %v1134_v14  ;;  %v1163_v27 = vor.u32 1.1754944e-38, %v1162_v46  ;;  %vm1161_vm8 = vcmp.eq.f32.partialorder %v1160_v37, 8.507059e+37 }
 0x2bd   : > { %v1152_v57 = vmul.f32 %v1520_v7, %v925_v42  ;;  %v1144_v11 = vsel %vm1143_vm1, %v1518_v16, %v1140_v50  ;;  %vm1157_vm5 = vweird.f32 %v1520_v7 }
 0x2be   : > { %v1149_v6 = vsel %vm1146_vm3, %v1148_v28, %v1144_v11  ;;  %vm1158_vm7 = vmor %vm1156_vm6, %vm1157_vm5 }
 0x2bf   : > { %v1153_v31 = vsub.f32 1.0, %v1152_v57  ;;  %v1150_v54 = vmul.f32 %v2073_v63, %v1149_v6 }
 0x2c1   : > { %v1154_v51 = vmul.f32 %v1520_v7, %v1153_v31  ;;  %1210 = vrot.lane.b32.xlu2 %v1150_v54, %s1532_s8 }
 0x2c2   : > { %1208 = vrot.lane.b32.xlu1 %v1135_v20, %s1532_s8 }
 0x2c3   : > { %v1155_v0 = vadd.f32 %v1520_v7, %v1154_v51 }
 0x2c5   : > { %v1159_v45 = vsel %vm1158_vm7, %v1520_v7, %v1155_v0 }
 0x2c6   : > { %v1164_v18 = vsel %vm1161_vm8, %v1163_v27, %v1159_v45 }
 0x2c7   : > { %v1165_v63 = vmul.f32 %v2081_v48, %v1164_v18 }
 0x2c9   : > { %1212 = vrot.lane.b32.xlu0 %v1165_v63, %s1532_s8 }
 0x2ea   : > { %v1183_v62 = vpop.permute.xlu1 %1182 }
 0x2eb   : > { %1230 = vst.msk [vmem:[%s2377_s10] sm:$0xff] %vm877_vm4, %v1183_v62  ;;  %v1199_v48 = vpop.permute.xlu2 %1198 }
 0x2ec   : > { %1238 = vst.msk [vmem:[%s2377_s10 + $0x40] sm:$0xff] %vm877_vm4, %v1199_v48 }
 0x2fc   : > { %v1187_v23 = vpop.permute.xlu2 %1186 }
 0x2fd   : > { %1232 = vst.msk [vmem:[%s2377_s10 + $0x10] sm:$0xff] %vm877_vm4, %v1187_v23 }
 0x305   : > { %v1205_v29 = vpop.permute.xlu2 %1204 }
 0x306   : > { %1241 = vst.msk [vmem:[%s2377_s10 + $0x58] sm:$0xff] %vm877_vm4, %v1205_v29 }
 0x30b   : > { %v1185_v61 = vpop.permute.xlu0 %1184 }
 0x30c   : > { %1231 = vst.msk [vmem:[%s2377_s10 + $0x8] sm:$0xff] %vm877_vm4, %v1185_v61 }
 0x310   : > { %v1193_v24 = vpop.permute.xlu2 %1192 }
 0x311   : > { %1235 = vst.msk [vmem:[%s2377_s10 + $0x28] sm:$0xff] %vm877_vm4, %v1193_v24 }
 0x314   : > { %v1201_v17 = vpop.permute.xlu0 %1200 }
 0x315   : > { %1239 = vst.msk [vmem:[%s2377_s10 + $0x48] sm:$0xff] %vm877_vm4, %v1201_v17 }
 0x318   : > { %v1203_v5 = vpop.permute.xlu1 %1202 }
 0x319   : > { %1240 = vst.msk [vmem:[%s2377_s10 + $0x50] sm:$0xff] %vm877_vm4, %v1203_v5 }
 0x31b   : > { %v1211_v49 = vpop.permute.xlu2 %1210 }
 0x31c   : > { %1244 = vst.msk [vmem:[%s2377_s10 + $0x70] sm:$0xff] %vm877_vm4, %v1211_v49 }
 0x31e   : > { %v1189_v59 = vpop.permute.xlu0 %1188 }
 0x31f   : > { %1233 = vst.msk [vmem:[%s2377_s10 + $0x18] sm:$0xff] %vm877_vm4, %v1189_v59 }
 0x322   : > { %v1191_v22 = vpop.permute.xlu1 %1190 }
 0x323   : > { %1234 = vst.msk [vmem:[%s2377_s10 + $0x20] sm:$0xff] %vm877_vm4, %v1191_v22 }
 0x326   : > { %v1207_v25 = vpop.permute.xlu0 %1206 }
 0x327   : > { %1242 = vst.msk [vmem:[%s2377_s10 + $0x60] sm:$0xff] %vm877_vm4, %v1207_v25 }
 0x32c   : > { %v1197_v1 = vpop.permute.xlu1 %1196 }
 0x32d   : > { %1237 = vst.msk [vmem:[%s2377_s10 + $0x38] sm:$0xff] %vm877_vm4, %v1197_v1 }
 0x32e   : > { %v1195_v32 = vpop.permute.xlu0 %1194 }
 0x32f   : > { %1236 = vst.msk [vmem:[%s2377_s10 + $0x30] sm:$0xff] %vm877_vm4, %v1195_v32 }
 0x334   : > { %v1209_v9 = vpop.permute.xlu1 %1208 }
 0x335   : > { %1243 = vst.msk [vmem:[%s2377_s10 + $0x68] sm:$0xff] %vm877_vm4, %v1209_v9 }
 0x33b   : > { %v1213_v15 = vpop.permute.xlu0 %1212 }
 0x33c   : > { %1245 = vst.msk [vmem:[%s2377_s10 + $0x78] sm:$0xff] %vm877_vm4, %v1213_v15 }
 0x33d PF: > { %s15_s15 = sadd.s32 1, %s1527_s15  }
 0x33e   : > { %p12_p4 = scmp.ge.s32.totalorder %s15_s15, 4  }
 0x340   :  { %14 = sbr.rel (!%p12_p4) target bundleno = 1 (0x1), region = 74 }

</bundles_post_ra>
